<compile_context>
chip_gen: v7x
topology: tpu7x:2x2x1
jax: 0.10.0
libtpu: 0.0.40
codegen_flags: <defaults>
</compile_context>

<pallas_src>
import functools
import math

import jax
import jax.numpy as jnp
from jax import lax
from jax.experimental import pallas as pl
from jax.experimental.pallas import tpu as pltpu


def _bert_attention_kernel(
    x_full_ref,   # (1, S, H)   full sequence (input dtype)  -> Q/K/V source
    x_q_ref,      # (1, Tq, H)  query tile (residual input)
    wqkv_ref,     # (H, 3H)     fused pre-transposed QKV weight (Q pre-scaled), compute dtype
    bqkv_ref,     # (1, 3H)     fused bias (Q part pre-scaled), f32
    wo_ref,       # (H, H)      output projection (in, out), compute dtype
    bo_ref,       # (1, H)      f32
    ln_w_ref,     # (1, H)      f32
    ln_b_ref,     # (1, H)      f32
    o_ref,        # (1, Tq, H)
    qkv_ref,      # VMEM scratch (S, 3H), compute dtype — cached Q/K/V
    ctx_ref,      # VMEM scratch (Tq, H), compute dtype — per-tile context slab
    *,
    num_heads: int,
    eps: float,
    approx_recip: bool,
):
    S = x_full_ref.shape[1]
    H = x_full_ref.shape[2]
    Tq = x_q_ref.shape[1]
    dh = H // num_heads
    cdt = qkv_ref.dtype
    qt = pl.program_id(1)

    # ---- fused QKV projection: once per batch element, cached in VMEM -------
    @pl.when(qt == 0)
    def _():
        xf = x_full_ref[0].astype(cdt)                                    # (S, H)
        qkv = jnp.dot(xf, wqkv_ref[...], preferred_element_type=jnp.float32)
        qkv_ref[...] = (qkv + bqkv_ref[...]).astype(cdt)                  # (S, 3H)

    # Query rows for this tile (1/sqrt(dh) already folded into Wq / bq).
    row0 = pl.multiple_of(qt * Tq, Tq)
    q_tile = qkv_ref[pl.ds(row0, Tq), 0:H]                                # (Tq, H)

    # ---- per-head attention; ctx written into the (Tq, H) scratch slab ------
    qkt_dims = (((1,), (1,)), ((), ()))            # contract last dims (no .T)
    for h in range(num_heads):
        lo = h * dh
        qh = q_tile[:, lo:lo + dh]                                        # (Tq, dh)
        kh = qkv_ref[:, H + lo:H + lo + dh]                               # (S, dh)
        vh = qkv_ref[:, 2 * H + lo:2 * H + lo + dh]                       # (S, dh)
        s = lax.dot_general(qh, kh, qkt_dims,
                            preferred_element_type=jnp.float32)           # (Tq, S)
        # numerically stable softmax (stats in f32)
        s = s - jnp.max(s, axis=-1, keepdims=True)
        e = jnp.exp(s)
        inv = pl.reciprocal(jnp.sum(e, axis=-1, keepdims=True),
                            approx=approx_recip)
        p = (e * inv).astype(cdt)                                         # (Tq, S)
        ctx_ref[:, lo:lo + dh] = jnp.dot(
            p, vh, preferred_element_type=jnp.float32).astype(cdt)

    # ---- one full-depth output projection + residual + TF-style LayerNorm ---
    y = jnp.dot(ctx_ref[...], wo_ref[...],
                preferred_element_type=jnp.float32) + bo_ref[...]         # (Tq, H)
    z = y + x_q_ref[0].astype(jnp.float32)
    u = jnp.mean(z, axis=-1, keepdims=True)
    d = z - u
    var = jnp.mean(d * d, axis=-1, keepdims=True)
    zn = d * lax.rsqrt(var + eps)
    o_ref[0] = (ln_w_ref[...] * zn + ln_b_ref[...]).astype(o_ref.dtype)


def prepare_bert_attention_params(params, *, num_heads, compute_dtype=None):
    """One-time parameter prep (call once, reuse every forward call):
    transpose nn.Linear weights to (in, out), fuse Q/K/V into a single (H, 3H)
    weight, fold the 1/sqrt(dh) score scale into the Q projection, and cast the
    MXU weights to the compute dtype (bf16 for production)."""
    wq, bq, wk, bk, wv, bv, wo, bo, ln_w, ln_b = params
    H = wq.shape[0]
    if H % num_heads != 0:
        raise ValueError(f"hidden size {H} is not a multiple of num_heads {num_heads}")
    dh = H // num_heads
    scale = 1.0 / math.sqrt(dh)
    cdt = compute_dtype if compute_dtype is not None else wq.dtype

    wqkv_t = jnp.concatenate([wq.T * scale, wk.T, wv.T], axis=1).astype(cdt)   # (H, 3H)
    bqkv = jnp.concatenate([bq * scale, bk, bv]).reshape(1, 3 * H).astype(jnp.float32)
    wo_t = wo.T.astype(cdt)                                                    # (H, H)
    return (wqkv_t, bqkv, wo_t,
            bo.reshape(1, H).astype(jnp.float32),
            ln_w.reshape(1, H).astype(jnp.float32),
            ln_b.reshape(1, H).astype(jnp.float32))


def _pick_q_tile(S, max_tile=256):
    if S <= max_tile:
        return S
    for t in range(max_tile - max_tile % 8, 7, -8):
        if S % t == 0:
            return t
    return S


def _vmem_limit_bytes(S, Tq, H, in_bytes, cdt_bytes):
    weights = 4 * H * H * cdt_bytes                     # fused QKV (3*H*H) + Wo (H*H)
    small = 8 * H * 4                                   # biases + LN params
    io = (S * H + 4 * Tq * H) * in_bytes                # x_full + 2x q-tile + 2x out
    scratch = (3 * S * H + Tq * H) * cdt_bytes          # cached QKV + ctx slab
    temps = 6 * Tq * S * 4 + 8 * Tq * H * 4             # score/softmax/LN temporaries
    return int(min(weights + small + io + scratch + temps + (8 << 20), 64 << 20))


def _build_call(B, S, H, Tq, in_dtype, cdt, *, num_heads, eps, approx_recip,
                single_buffer_params):
    n_qt = S // Tq
    const_idx = lambda b, qt: (0, 0)

    def param_spec(shape):
        if single_buffer_params:
            # Grid-invariant operands: constant index_map -> no double buffer needed.
            return pl.BlockSpec(shape, const_idx, pipeline_mode=pl.Buffered(1))
        return pl.BlockSpec(shape, const_idx)

    kernel = functools.partial(_bert_attention_kernel, num_heads=num_heads,
                               eps=eps, approx_recip=approx_recip)
    in_b = jnp.dtype(in_dtype).itemsize
    cdt_b = jnp.dtype(cdt).itemsize

    return pl.pallas_call(
        kernel,
        out_shape=jax.ShapeDtypeStruct((B, S, H), in_dtype),
        grid_spec=pltpu.PrefetchScalarGridSpec(
            num_scalar_prefetch=0,
            grid=(B, n_qt),
            in_specs=[
                pl.BlockSpec((1, S, H), lambda b, qt: (b, 0, 0)),    # x (full seq, QKV source)
                pl.BlockSpec((1, Tq, H), lambda b, qt: (b, qt, 0)),  # x (query tile / residual)
                param_spec((H, 3 * H)),                              # fused QKV weight
                param_spec((1, 3 * H)),                              # fused QKV bias
                param_spec((H, H)),                                  # output weight
                param_spec((1, H)),                                  # output bias
                param_spec((1, H)),                                  # LayerNorm gamma
                param_spec((1, H)),                                  # LayerNorm beta
            ],
            out_specs=pl.BlockSpec((1, Tq, H), lambda b, qt: (b, qt, 0)),
            scratch_shapes=[
                pltpu.VMEM((S, 3 * H), cdt),      # cached Q/K/V for this batch element
                pltpu.VMEM((Tq, H), cdt),         # per-tile context slab
            ],
        ),
        compiler_params=pltpu.CompilerParams(
            dimension_semantics=("parallel", "arbitrary"),
            vmem_limit_bytes=_vmem_limit_bytes(S, Tq, H, in_b, cdt_b),
        ),
    )


def bert_attention(hidden_states, prepared_params, *, num_heads, eps=1e-12,
                   q_tile=None):
    """hidden_states: (B, S, H); prepared_params from prepare_bert_attention_params."""
    B, S, H = hidden_states.shape
    wqkv_t, bqkv, wo_t, bo, ln_w, ln_b = prepared_params
    cdt = wqkv_t.dtype
    Tq = q_tile if q_tile is not None else _pick_q_tile(S)
    if S % Tq != 0:
        raise ValueError(f"q_tile {Tq} must divide sequence length {S}")
    approx_recip = (jnp.dtype(cdt) == jnp.dtype(jnp.bfloat16))

    args = (hidden_states, hidden_states, wqkv_t, bqkv, wo_t, bo, ln_w, ln_b)
    try:
        fn = _build_call(B, S, H, Tq, hidden_states.dtype, cdt,
                         num_heads=num_heads, eps=eps, approx_recip=approx_recip,
                         single_buffer_params=True)
        return fn(*args)
    except Exception:
        # Fallback if this JAX build rejects pl.Buffered(1) on the top-level grid
        # pipeline: identical kernel, default double-buffered invariant operands.
        fn = _build_call(B, S, H, Tq, hidden_states.dtype, cdt,
                         num_heads=num_heads, eps=eps, approx_recip=approx_recip,
                         single_buffer_params=False)
        return fn(*args)


if __name__ == "__main__":
    B, S, H, NH = 2, 8, 32, 4
    EPS = 1e-12

    key = jax.random.PRNGKey(0)
    keys = jax.random.split(key, 11)
    hidden_states = jax.random.normal(keys[0], (B, S, H), dtype=jnp.float32)

    def init_linear(kw, kb):
        w = jax.random.normal(kw, (H, H), dtype=jnp.float32) * 0.05
        b = jax.random.normal(kb, (H,), dtype=jnp.float32) * 0.05
        return w, b

    wq, bq = init_linear(keys[1], keys[2])
    wk, bk = init_linear(keys[3], keys[4])
    wv, bv = init_linear(keys[5], keys[6])
    wo, bo = init_linear(keys[7], keys[8])
    ln_w = jnp.ones((H,), jnp.float32) + 0.1 * jax.random.normal(keys[9], (H,), jnp.float32)
    ln_b = 0.1 * jax.random.normal(keys[10], (H,), jnp.float32)
    params = (wq, bq, wk, bk, wv, bv, wo, bo, ln_w, ln_b)

    # Pure-JAX reference replicating the PyTorch BertAttention forward.
    def ref(x):
        dh = H // NH
        q = x @ wq.T + bq
        k = x @ wk.T + bk
        v = x @ wv.T + bv
        heads = lambda t: t.reshape(B, S, NH, dh).transpose(0, 2, 1, 3)
        qh, kh, vh = heads(q), heads(k), heads(v)
        scores = jnp.einsum('bhqd,bhkd->bhqk', qh, kh) / math.sqrt(dh)
        probs = jax.nn.softmax(scores, axis=-1)
        ctx = jnp.einsum('bhqk,bhkd->bhqd', probs, vh)
        ctx = ctx.transpose(0, 2, 1, 3).reshape(B, S, H)
        y = ctx @ wo.T + bo
        z = y + x
        u = z.mean(-1, keepdims=True)
        s2 = ((z - u) ** 2).mean(-1, keepdims=True)
        zn = (z - u) / jnp.sqrt(s2 + EPS)
        return ln_w * zn + ln_b

    expected = ref(hidden_states)

    # 1) f32 compute path: strict check against the reference.
    prep_f32 = prepare_bert_attention_params(params, num_heads=NH,
                                             compute_dtype=jnp.float32)
    out = jax.block_until_ready(
        bert_attention(hidden_states, prep_f32, num_heads=NH, eps=EPS))
    assert out.shape == (B, S, H)
    err = float(jnp.max(jnp.abs(out - expected)))
    assert jnp.allclose(out, expected, atol=1e-4, rtol=1e-4), err

    # 2) bf16 MXU path (production configuration): bf16 weights/activations on
    #    the MXU with f32 accumulation / softmax stats / LayerNorm — looser
    #    tolerance (~0.4% relative from bf16 quantization of inputs & outputs).
    prep_bf16 = prepare_bert_attention_params(params, num_heads=NH,
                                              compute_dtype=jnp.bfloat16)
    out_bf = jax.block_until_ready(
        bert_attention(hidden_states.astype(jnp.bfloat16), prep_bf16,
                       num_heads=NH, eps=EPS))
    err_bf = float(jnp.max(jnp.abs(out_bf.astype(jnp.float32) - expected)))
    assert err_bf < 0.15, err_bf

    print("KERNEL_OK")
</pallas_src>

<mosaic_0001>
module attributes {stable_mosaic.version = 11 : i64} {
  func.func @_bert_attention_kernel(%arg0: i32, %arg1: i32, %arg2: memref<1x8x32xf32, #tpu.memory_space<vmem>>, %arg3: memref<1x8x32xf32, #tpu.memory_space<vmem>>, %arg4: memref<32x96xf32, #tpu.memory_space<vmem>>, %arg5: memref<1x96xf32, #tpu.memory_space<vmem>>, %arg6: memref<32x32xf32, #tpu.memory_space<vmem>>, %arg7: memref<1x32xf32, #tpu.memory_space<vmem>>, %arg8: memref<1x32xf32, #tpu.memory_space<vmem>>, %arg9: memref<1x32xf32, #tpu.memory_space<vmem>>, %arg10: memref<1x8x32xf32, #tpu.memory_space<vmem>>, %arg11: memref<8x96xf32, #tpu.memory_space<vmem>>, %arg12: memref<8x32xf32, #tpu.memory_space<vmem>>) attributes {dimension_semantics = [#tpu.dimension_semantics<parallel>, #tpu.dimension_semantics<arbitrary>], iteration_bounds = array<i64: 2, 1>, scalar_prefetch = 0 : i64, scratch_operands = 2 : i64, tpu.core_type = #tpu.core_type<tc>, window_params = [{transform_indices = @transform_0, window_bounds = array<i64: 1, 8, 32>}, {transform_indices = @transform_1, window_bounds = array<i64: 1, 8, 32>}, {pipeline_mode = #tpu.pipeline_mode<synchronous>, transform_indices = @transform_2, window_bounds = array<i64: 32, 96>}, {pipeline_mode = #tpu.pipeline_mode<synchronous>, transform_indices = @transform_3, window_bounds = array<i64: 1, 96>}, {pipeline_mode = #tpu.pipeline_mode<synchronous>, transform_indices = @transform_4, window_bounds = array<i64: 32, 32>}, {pipeline_mode = #tpu.pipeline_mode<synchronous>, transform_indices = @transform_5, window_bounds = array<i64: 1, 32>}, {pipeline_mode = #tpu.pipeline_mode<synchronous>, transform_indices = @transform_6, window_bounds = array<i64: 1, 32>}, {pipeline_mode = #tpu.pipeline_mode<synchronous>, transform_indices = @transform_7, window_bounds = array<i64: 1, 32>}, {transform_indices = @transform_8, window_bounds = array<i64: 1, 8, 32>}]} {
    %c0_i32 = arith.constant 0 : i32
    %0 = arith.cmpi eq, %arg1, %c0_i32 : i32
    %1 = arith.extui %0 : i1 to i32
    %c0_i32_0 = arith.constant 0 : i32
    %2 = arith.cmpi ne, %1, %c0_i32_0 : i32
    scf.if %2 {
      %c0_51 = arith.constant 0 : index
      %c0_52 = arith.constant 0 : index
      %c0_53 = arith.constant 0 : index
      %105 = vector.load %arg2[%c0_51, %c0_52, %c0_53] : memref<1x8x32xf32, #tpu.memory_space<vmem>>, vector<1x8x32xf32>
      %106 = vector.shape_cast %105 : vector<1x8x32xf32> to vector<8x32xf32>
      %c0_54 = arith.constant 0 : index
      %c0_55 = arith.constant 0 : index
      %107 = vector.load %arg4[%c0_54, %c0_55] : memref<32x96xf32, #tpu.memory_space<vmem>>, vector<32x96xf32>
      %cst_56 = arith.constant dense<0.000000e+00> : vector<8x96xf32>
      %108 = tpu.matmul %106, %107, %cst_56 {dimension_numbers = #tpu.dot_dimension_numbers<[1], [0], [0], [1], [0, 0, 1, 1], [], []>} : vector<8x32xf32>, vector<32x96xf32>, vector<8x96xf32> -> vector<8x96xf32>
      %c0_57 = arith.constant 0 : index
      %c0_58 = arith.constant 0 : index
      %109 = vector.load %arg5[%c0_57, %c0_58] : memref<1x96xf32, #tpu.memory_space<vmem>>, vector<1x96xf32>
      %110 = vector.broadcast %109 : vector<1x96xf32> to vector<8x96xf32>
      %111 = arith.addf %108, %110 : vector<8x96xf32>
      %c0_59 = arith.constant 0 : index
      %c0_60 = arith.constant 0 : index
      %112 = vector.load %arg11[%c0_59, %c0_60] : memref<8x96xf32, #tpu.memory_space<vmem>>, vector<8x96xf32>
      tpu.vector_store %arg11[%c0_59, %c0_60], %111 {strides = array<i32>} : memref<8x96xf32, #tpu.memory_space<vmem>>, vector<8x96xf32>,
    } else {
    }
    %c8_i32 = arith.constant 8 : i32
    %3 = arith.muli %arg1, %c8_i32 : i32
    %4 = tpu.assume_multiple %3, 8 : i32
    %5 = arith.index_cast %4 : i32 to index
    %c0 = arith.constant 0 : index
    %6 = vector.load %arg11[%5, %c0] : memref<8x96xf32, #tpu.memory_space<vmem>>, vector<8x32xf32>
    %7 = vector.extract_strided_slice %6 {offsets = [0, 0], sizes = [8, 8], strides = [1, 1]} : vector<8x32xf32> to vector<8x8xf32>
    %c0_1 = arith.constant 0 : index
    %c32 = arith.constant 32 : index
    %8 = vector.load %arg11[%c0_1, %c32] : memref<8x96xf32, #tpu.memory_space<vmem>>, vector<8x8xf32>
    %c0_2 = arith.constant 0 : index
    %c64 = arith.constant 64 : index
    %9 = vector.load %arg11[%c0_2, %c64] : memref<8x96xf32, #tpu.memory_space<vmem>>, vector<8x8xf32>
    %cst = arith.constant dense<0.000000e+00> : vector<8x8xf32>
    %10 = tpu.matmul %7, %8, %cst {dimension_numbers = #tpu.dot_dimension_numbers<[1], [1], [0], [0], [0, 0, 1, 0], [], []>} : vector<8x8xf32>, vector<8x8xf32>, vector<8x8xf32> -> vector<8x8xf32>
    %cst_3 = arith.constant dense<0xFF800000> : vector<8xf32>
    %11 = vector.multi_reduction <maximumf>, %10, %cst_3 [1] : vector<8x8xf32> to vector<8xf32>
    %12 = vector.shape_cast %11 : vector<8xf32> to vector<8x1xf32>
    %13 = vector.broadcast %12 : vector<8x1xf32> to vector<8x8xf32>
    %14 = arith.subf %10, %13 : vector<8x8xf32>
    %15 = math.exp %14 : vector<8x8xf32>
    %cst_4 = arith.constant dense<0.000000e+00> : vector<8xf32>
    %16 = vector.multi_reduction <add>, %15, %cst_4 [1] : vector<8x8xf32> to vector<8xf32>
    %17 = vector.shape_cast %16 : vector<8xf32> to vector<8x1xf32>
    %18 = tpu.reciprocal %17 : vector<8x1xf32> -> vector<8x1xf32>
    %19 = vector.broadcast %18 : vector<8x1xf32> to vector<8x8xf32>
    %20 = arith.mulf %15, %19 : vector<8x8xf32>
    %cst_5 = arith.constant dense<0.000000e+00> : vector<8x8xf32>
    %21 = tpu.matmul %20, %9, %cst_5 {dimension_numbers = #tpu.dot_dimension_numbers<[1], [0], [0], [1], [0, 0, 1, 1], [], []>} : vector<8x8xf32>, vector<8x8xf32>, vector<8x8xf32> -> vector<8x8xf32>
    %c0_6 = arith.constant 0 : index
    %c0_7 = arith.constant 0 : index
    %22 = vector.load %arg12[%c0_6, %c0_7] : memref<8x32xf32, #tpu.memory_space<vmem>>, vector<8x8xf32>
    tpu.vector_store %arg12[%c0_6, %c0_7], %21 {strides = array<i32>} : memref<8x32xf32, #tpu.memory_space<vmem>>, vector<8x8xf32>,
    %23 = vector.extract_strided_slice %6 {offsets = [0, 8], sizes = [8, 8], strides = [1, 1]} : vector<8x32xf32> to vector<8x8xf32>
    %c0_8 = arith.constant 0 : index
    %c40 = arith.constant 40 : index
    %24 = vector.load %arg11[%c0_8, %c40] : memref<8x96xf32, #tpu.memory_space<vmem>>, vector<8x8xf32>
    %c0_9 = arith.constant 0 : index
    %c72 = arith.constant 72 : index
    %25 = vector.load %arg11[%c0_9, %c72] : memref<8x96xf32, #tpu.memory_space<vmem>>, vector<8x8xf32>
    %cst_10 = arith.constant dense<0.000000e+00> : vector<8x8xf32>
    %26 = tpu.matmul %23, %24, %cst_10 {dimension_numbers = #tpu.dot_dimension_numbers<[1], [1], [0], [0], [0, 0, 1, 0], [], []>} : vector<8x8xf32>, vector<8x8xf32>, vector<8x8xf32> -> vector<8x8xf32>
    %cst_11 = arith.constant dense<0xFF800000> : vector<8xf32>
    %27 = vector.multi_reduction <maximumf>, %26, %cst_11 [1] : vector<8x8xf32> to vector<8xf32>
    %28 = vector.shape_cast %27 : vector<8xf32> to vector<8x1xf32>
    %29 = vector.broadcast %28 : vector<8x1xf32> to vector<8x8xf32>
    %30 = arith.subf %26, %29 : vector<8x8xf32>
    %31 = math.exp %30 : vector<8x8xf32>
    %cst_12 = arith.constant dense<0.000000e+00> : vector<8xf32>
    %32 = vector.multi_reduction <add>, %31, %cst_12 [1] : vector<8x8xf32> to vector<8xf32>
    %33 = vector.shape_cast %32 : vector<8xf32> to vector<8x1xf32>
    %34 = tpu.reciprocal %33 : vector<8x1xf32> -> vector<8x1xf32>
    %35 = vector.broadcast %34 : vector<8x1xf32> to vector<8x8xf32>
    %36 = arith.mulf %31, %35 : vector<8x8xf32>
    %cst_13 = arith.constant dense<0.000000e+00> : vector<8x8xf32>
    %37 = tpu.matmul %36, %25, %cst_13 {dimension_numbers = #tpu.dot_dimension_numbers<[1], [0], [0], [1], [0, 0, 1, 1], [], []>} : vector<8x8xf32>, vector<8x8xf32>, vector<8x8xf32> -> vector<8x8xf32>
    %c0_14 = arith.constant 0 : index
    %c8 = arith.constant 8 : index
    %38 = vector.load %arg12[%c0_14, %c8] : memref<8x32xf32, #tpu.memory_space<vmem>>, vector<8x8xf32>
    tpu.vector_store %arg12[%c0_14, %c8], %37 {strides = array<i32>} : memref<8x32xf32, #tpu.memory_space<vmem>>, vector<8x8xf32>,
    %39 = vector.extract_strided_slice %6 {offsets = [0, 16], sizes = [8, 8], strides = [1, 1]} : vector<8x32xf32> to vector<8x8xf32>
    %c0_15 = arith.constant 0 : index
    %c48 = arith.constant 48 : index
    %40 = vector.load %arg11[%c0_15, %c48] : memref<8x96xf32, #tpu.memory_space<vmem>>, vector<8x8xf32>
    %c0_16 = arith.constant 0 : index
    %c80 = arith.constant 80 : index
    %41 = vector.load %arg11[%c0_16, %c80] : memref<8x96xf32, #tpu.memory_space<vmem>>, vector<8x8xf32>
    %cst_17 = arith.constant dense<0.000000e+00> : vector<8x8xf32>
    %42 = tpu.matmul %39, %40, %cst_17 {dimension_numbers = #tpu.dot_dimension_numbers<[1], [1], [0], [0], [0, 0, 1, 0], [], []>} : vector<8x8xf32>, vector<8x8xf32>, vector<8x8xf32> -> vector<8x8xf32>
    %cst_18 = arith.constant dense<0xFF800000> : vector<8xf32>
    %43 = vector.multi_reduction <maximumf>, %42, %cst_18 [1] : vector<8x8xf32> to vector<8xf32>
    %44 = vector.shape_cast %43 : vector<8xf32> to vector<8x1xf32>
    %45 = vector.broadcast %44 : vector<8x1xf32> to vector<8x8xf32>
    %46 = arith.subf %42, %45 : vector<8x8xf32>
    %47 = math.exp %46 : vector<8x8xf32>
    %cst_19 = arith.constant dense<0.000000e+00> : vector<8xf32>
    %48 = vector.multi_reduction <add>, %47, %cst_19 [1] : vector<8x8xf32> to vector<8xf32>
    %49 = vector.shape_cast %48 : vector<8xf32> to vector<8x1xf32>
    %50 = tpu.reciprocal %49 : vector<8x1xf32> -> vector<8x1xf32>
    %51 = vector.broadcast %50 : vector<8x1xf32> to vector<8x8xf32>
    %52 = arith.mulf %47, %51 : vector<8x8xf32>
    %cst_20 = arith.constant dense<0.000000e+00> : vector<8x8xf32>
    %53 = tpu.matmul %52, %41, %cst_20 {dimension_numbers = #tpu.dot_dimension_numbers<[1], [0], [0], [1], [0, 0, 1, 1], [], []>} : vector<8x8xf32>, vector<8x8xf32>, vector<8x8xf32> -> vector<8x8xf32>
    %c0_21 = arith.constant 0 : index
    %c16 = arith.constant 16 : index
    %54 = vector.load %arg12[%c0_21, %c16] : memref<8x32xf32, #tpu.memory_space<vmem>>, vector<8x8xf32>
    tpu.vector_store %arg12[%c0_21, %c16], %53 {strides = array<i32>} : memref<8x32xf32, #tpu.memory_space<vmem>>, vector<8x8xf32>,
    %55 = vector.extract_strided_slice %6 {offsets = [0, 24], sizes = [8, 8], strides = [1, 1]} : vector<8x32xf32> to vector<8x8xf32>
    %c0_22 = arith.constant 0 : index
    %c56 = arith.constant 56 : index
    %56 = vector.load %arg11[%c0_22, %c56] : memref<8x96xf32, #tpu.memory_space<vmem>>, vector<8x8xf32>
    %c0_23 = arith.constant 0 : index
    %c88 = arith.constant 88 : index
    %57 = vector.load %arg11[%c0_23, %c88] : memref<8x96xf32, #tpu.memory_space<vmem>>, vector<8x8xf32>
    %cst_24 = arith.constant dense<0.000000e+00> : vector<8x8xf32>
    %58 = tpu.matmul %55, %56, %cst_24 {dimension_numbers = #tpu.dot_dimension_numbers<[1], [1], [0], [0], [0, 0, 1, 0], [], []>} : vector<8x8xf32>, vector<8x8xf32>, vector<8x8xf32> -> vector<8x8xf32>
    %cst_25 = arith.constant dense<0xFF800000> : vector<8xf32>
    %59 = vector.multi_reduction <maximumf>, %58, %cst_25 [1] : vector<8x8xf32> to vector<8xf32>
    %60 = vector.shape_cast %59 : vector<8xf32> to vector<8x1xf32>
    %61 = vector.broadcast %60 : vector<8x1xf32> to vector<8x8xf32>
    %62 = arith.subf %58, %61 : vector<8x8xf32>
    %63 = math.exp %62 : vector<8x8xf32>
    %cst_26 = arith.constant dense<0.000000e+00> : vector<8xf32>
    %64 = vector.multi_reduction <add>, %63, %cst_26 [1] : vector<8x8xf32> to vector<8xf32>
    %65 = vector.shape_cast %64 : vector<8xf32> to vector<8x1xf32>
    %66 = tpu.reciprocal %65 : vector<8x1xf32> -> vector<8x1xf32>
    %67 = vector.broadcast %66 : vector<8x1xf32> to vector<8x8xf32>
    %68 = arith.mulf %63, %67 : vector<8x8xf32>
    %cst_27 = arith.constant dense<0.000000e+00> : vector<8x8xf32>
    %69 = tpu.matmul %68, %57, %cst_27 {dimension_numbers = #tpu.dot_dimension_numbers<[1], [0], [0], [1], [0, 0, 1, 1], [], []>} : vector<8x8xf32>, vector<8x8xf32>, vector<8x8xf32> -> vector<8x8xf32>
    %c0_28 = arith.constant 0 : index
    %c24 = arith.constant 24 : index
    %70 = vector.load %arg12[%c0_28, %c24] : memref<8x32xf32, #tpu.memory_space<vmem>>, vector<8x8xf32>
    tpu.vector_store %arg12[%c0_28, %c24], %69 {strides = array<i32>} : memref<8x32xf32, #tpu.memory_space<vmem>>, vector<8x8xf32>,
    %c0_29 = arith.constant 0 : index
    %c0_30 = arith.constant 0 : index
    %71 = vector.load %arg12[%c0_29, %c0_30] : memref<8x32xf32, #tpu.memory_space<vmem>>, vector<8x32xf32>
    %c0_31 = arith.constant 0 : index
    %c0_32 = arith.constant 0 : index
    %72 = vector.load %arg6[%c0_31, %c0_32] : memref<32x32xf32, #tpu.memory_space<vmem>>, vector<32x32xf32>
    %cst_33 = arith.constant dense<0.000000e+00> : vector<8x32xf32>
    %73 = tpu.matmul %71, %72, %cst_33 {dimension_numbers = #tpu.dot_dimension_numbers<[1], [0], [0], [1], [0, 0, 1, 1], [], []>} : vector<8x32xf32>, vector<32x32xf32>, vector<8x32xf32> -> vector<8x32xf32>
    %c0_34 = arith.constant 0 : index
    %c0_35 = arith.constant 0 : index
    %74 = vector.load %arg7[%c0_34, %c0_35] : memref<1x32xf32, #tpu.memory_space<vmem>>, vector<1x32xf32>
    %75 = vector.broadcast %74 : vector<1x32xf32> to vector<8x32xf32>
    %76 = arith.addf %73, %75 : vector<8x32xf32>
    %c0_36 = arith.constant 0 : index
    %c0_37 = arith.constant 0 : index
    %c0_38 = arith.constant 0 : index
    %77 = vector.load %arg3[%c0_36, %c0_37, %c0_38] : memref<1x8x32xf32, #tpu.memory_space<vmem>>, vector<1x8x32xf32>
    %78 = vector.shape_cast %77 : vector<1x8x32xf32> to vector<8x32xf32>
    %79 = arith.addf %76, %78 : vector<8x32xf32>
    %cst_39 = arith.constant dense<0.000000e+00> : vector<8xf32>
    %80 = vector.multi_reduction <add>, %79, %cst_39 [1] : vector<8x32xf32> to vector<8xf32>
    %81 = vector.shape_cast %80 : vector<8xf32> to vector<8x1xf32>
    %cst_40 = arith.constant 3.200000e+01 : f32
    %82 = vector.broadcast %cst_40 : f32 to vector<8x1xf32>
    %83 = arith.divf %81, %82 : vector<8x1xf32>
    %84 = vector.broadcast %83 : vector<8x1xf32> to vector<8x32xf32>
    %85 = arith.subf %79, %84 : vector<8x32xf32>
    %86 = arith.mulf %85, %85 : vector<8x32xf32>
    %cst_41 = arith.constant dense<0.000000e+00> : vector<8xf32>
    %87 = vector.multi_reduction <add>, %86, %cst_41 [1] : vector<8x32xf32> to vector<8xf32>
    %88 = vector.shape_cast %87 : vector<8xf32> to vector<8x1xf32>
    %cst_42 = arith.constant 3.200000e+01 : f32
    %89 = vector.broadcast %cst_42 : f32 to vector<8x1xf32>
    %90 = arith.divf %88, %89 : vector<8x1xf32>
    %cst_43 = arith.constant 9.99999996E-13 : f32
    %91 = vector.broadcast %cst_43 : f32 to vector<8x1xf32>
    %92 = arith.addf %90, %91 : vector<8x1xf32>
    %93 = math.rsqrt %92 : vector<8x1xf32>
    %94 = vector.broadcast %93 : vector<8x1xf32> to vector<8x32xf32>
    %95 = arith.mulf %85, %94 : vector<8x32xf32>
    %c0_44 = arith.constant 0 : index
    %c0_45 = arith.constant 0 : index
    %96 = vector.load %arg8[%c0_44, %c0_45] : memref<1x32xf32, #tpu.memory_space<vmem>>, vector<1x32xf32>
    %97 = vector.broadcast %96 : vector<1x32xf32> to vector<8x32xf32>
    %98 = arith.mulf %97, %95 : vector<8x32xf32>
    %c0_46 = arith.constant 0 : index
    %c0_47 = arith.constant 0 : index
    %99 = vector.load %arg9[%c0_46, %c0_47] : memref<1x32xf32, #tpu.memory_space<vmem>>, vector<1x32xf32>
    %100 = vector.broadcast %99 : vector<1x32xf32> to vector<8x32xf32>
    %101 = arith.addf %98, %100 : vector<8x32xf32>
    %c0_48 = arith.constant 0 : index
    %c0_49 = arith.constant 0 : index
    %c0_50 = arith.constant 0 : index
    %102 = vector.load %arg10[%c0_48, %c0_49, %c0_50] : memref<1x8x32xf32, #tpu.memory_space<vmem>>, vector<1x8x32xf32>
    %103 = vector.shape_cast %102 : vector<1x8x32xf32> to vector<8x32xf32>
    %104 = vector.shape_cast %101 : vector<8x32xf32> to vector<1x8x32xf32>
    tpu.vector_store %arg10[%c0_48, %c0_49, %c0_50], %104 {strides = array<i32>} : memref<1x8x32xf32, #tpu.memory_space<vmem>>, vector<1x8x32xf32>,
    return
  }
  func.func @transform_0(%arg0: i32, %arg1: i32) -> (i32, i32, i32) {
    %c0_i32 = arith.constant 0 : i32
    %c0_i32_0 = arith.constant 0 : i32
    %c0_i32_1 = arith.constant 0 : i32
    return %arg0, %c0_i32, %c0_i32_0 : i32, i32, i32
  }
  func.func @transform_1(%arg0: i32, %arg1: i32) -> (i32, i32, i32) {
    %c0_i32 = arith.constant 0 : i32
    %c0_i32_0 = arith.constant 0 : i32
    return %arg0, %arg1, %c0_i32 : i32, i32, i32
  }
  func.func @transform_2(%arg0: i32, %arg1: i32) -> (i32, i32) {
    %c0_i32 = arith.constant 0 : i32
    %c0_i32_0 = arith.constant 0 : i32
    %c0_i32_1 = arith.constant 0 : i32
    return %c0_i32, %c0_i32_0 : i32, i32
  }
  func.func @transform_3(%arg0: i32, %arg1: i32) -> (i32, i32) {
    %c0_i32 = arith.constant 0 : i32
    %c0_i32_0 = arith.constant 0 : i32
    %c0_i32_1 = arith.constant 0 : i32
    return %c0_i32, %c0_i32_0 : i32, i32
  }
  func.func @transform_4(%arg0: i32, %arg1: i32) -> (i32, i32) {
    %c0_i32 = arith.constant 0 : i32
    %c0_i32_0 = arith.constant 0 : i32
    %c0_i32_1 = arith.constant 0 : i32
    return %c0_i32, %c0_i32_0 : i32, i32
  }
  func.func @transform_5(%arg0: i32, %arg1: i32) -> (i32, i32) {
    %c0_i32 = arith.constant 0 : i32
    %c0_i32_0 = arith.constant 0 : i32
    %c0_i32_1 = arith.constant 0 : i32
    return %c0_i32, %c0_i32_0 : i32, i32
  }
  func.func @transform_6(%arg0: i32, %arg1: i32) -> (i32, i32) {
    %c0_i32 = arith.constant 0 : i32
    %c0_i32_0 = arith.constant 0 : i32
    %c0_i32_1 = arith.constant 0 : i32
    return %c0_i32, %c0_i32_0 : i32, i32
  }
  func.func @transform_7(%arg0: i32, %arg1: i32) -> (i32, i32) {
    %c0_i32 = arith.constant 0 : i32
    %c0_i32_0 = arith.constant 0 : i32
    %c0_i32_1 = arith.constant 0 : i32
    return %c0_i32, %c0_i32_0 : i32, i32
  }
  func.func @transform_8(%arg0: i32, %arg1: i32) -> (i32, i32, i32) {
    %c0_i32 = arith.constant 0 : i32
    %c0_i32_0 = arith.constant 0 : i32
    return %arg0, %arg1, %c0_i32 : i32, i32, i32
  }
}

module attributes {stable_mosaic.version = 11 : i64} {
  func.func @_bert_attention_kernel(%arg0: i32, %arg1: i32, %arg2: memref<1x8x32xf32, #tpu.memory_space<vmem>>, %arg3: memref<1x8x32xf32, #tpu.memory_space<vmem>>, %arg4: memref<32x96xf32, #tpu.memory_space<vmem>>, %arg5: memref<1x96xf32, #tpu.memory_space<vmem>>, %arg6: memref<32x32xf32, #tpu.memory_space<vmem>>, %arg7: memref<1x32xf32, #tpu.memory_space<vmem>>, %arg8: memref<1x32xf32, #tpu.memory_space<vmem>>, %arg9: memref<1x32xf32, #tpu.memory_space<vmem>>, %arg10: memref<1x8x32xf32, #tpu.memory_space<vmem>>, %arg11: memref<8x96xf32, #tpu.memory_space<vmem>>, %arg12: memref<8x32xf32, #tpu.memory_space<vmem>>) attributes {dimension_semantics = [#tpu.dimension_semantics<parallel>, #tpu.dimension_semantics<arbitrary>], iteration_bounds = array<i64: 2, 1>, scalar_prefetch = 0 : i64, scratch_operands = 2 : i64, tpu.core_type = #tpu.core_type<tc>, window_params = [{transform_indices = @transform_0, window_bounds = array<i64: 1, 8, 32>}, {transform_indices = @transform_1, window_bounds = array<i64: 1, 8, 32>}, {pipeline_mode = #tpu.pipeline_mode<synchronous>, transform_indices = @transform_2, window_bounds = array<i64: 32, 96>}, {pipeline_mode = #tpu.pipeline_mode<synchronous>, transform_indices = @transform_3, window_bounds = array<i64: 1, 96>}, {pipeline_mode = #tpu.pipeline_mode<synchronous>, transform_indices = @transform_4, window_bounds = array<i64: 32, 32>}, {pipeline_mode = #tpu.pipeline_mode<synchronous>, transform_indices = @transform_5, window_bounds = array<i64: 1, 32>}, {pipeline_mode = #tpu.pipeline_mode<synchronous>, transform_indices = @transform_6, window_bounds = array<i64: 1, 32>}, {pipeline_mode = #tpu.pipeline_mode<synchronous>, transform_indices = @transform_7, window_bounds = array<i64: 1, 32>}, {transform_indices = @transform_8, window_bounds = array<i64: 1, 8, 32>}]} {
    %c0_i32 = arith.constant 0 : i32
    %0 = arith.cmpi eq, %arg1, %c0_i32 : i32
    %1 = arith.extui %0 : i1 to i32
    %c0_i32_0 = arith.constant 0 : i32
    %2 = arith.cmpi ne, %1, %c0_i32_0 : i32
    scf.if %2 {
      %c0_51 = arith.constant 0 : index
      %c0_52 = arith.constant 0 : index
      %c0_53 = arith.constant 0 : index
      %105 = vector.load %arg2[%c0_51, %c0_52, %c0_53] : memref<1x8x32xf32, #tpu.memory_space<vmem>>, vector<1x8x32xf32>
      %106 = vector.shape_cast %105 : vector<1x8x32xf32> to vector<8x32xf32>
      %c0_54 = arith.constant 0 : index
      %c0_55 = arith.constant 0 : index
      %107 = vector.load %arg4[%c0_54, %c0_55] : memref<32x96xf32, #tpu.memory_space<vmem>>, vector<32x96xf32>
      %cst_56 = arith.constant dense<0.000000e+00> : vector<8x96xf32>
      %108 = tpu.matmul %106, %107, %cst_56 {dimension_numbers = #tpu.dot_dimension_numbers<[1], [0], [0], [1], [0, 0, 1, 1], [], []>} : vector<8x32xf32>, vector<32x96xf32>, vector<8x96xf32> -> vector<8x96xf32>
      %c0_57 = arith.constant 0 : index
      %c0_58 = arith.constant 0 : index
      %109 = vector.load %arg5[%c0_57, %c0_58] : memref<1x96xf32, #tpu.memory_space<vmem>>, vector<1x96xf32>
      %110 = vector.broadcast %109 : vector<1x96xf32> to vector<8x96xf32>
      %111 = arith.addf %108, %110 : vector<8x96xf32>
      %c0_59 = arith.constant 0 : index
      %c0_60 = arith.constant 0 : index
      %112 = vector.load %arg11[%c0_59, %c0_60] : memref<8x96xf32, #tpu.memory_space<vmem>>, vector<8x96xf32>
      tpu.vector_store %arg11[%c0_59, %c0_60], %111 {strides = array<i32>} : memref<8x96xf32, #tpu.memory_space<vmem>>, vector<8x96xf32>,
    } else {
    }
    %c8_i32 = arith.constant 8 : i32
    %3 = arith.muli %arg1, %c8_i32 : i32
    %4 = tpu.assume_multiple %3, 8 : i32
    %5 = arith.index_cast %4 : i32 to index
    %c0 = arith.constant 0 : index
    %6 = vector.load %arg11[%5, %c0] : memref<8x96xf32, #tpu.memory_space<vmem>>, vector<8x32xf32>
    %7 = vector.extract_strided_slice %6 {offsets = [0, 0], sizes = [8, 8], strides = [1, 1]} : vector<8x32xf32> to vector<8x8xf32>
    %c0_1 = arith.constant 0 : index
    %c32 = arith.constant 32 : index
    %8 = vector.load %arg11[%c0_1, %c32] : memref<8x96xf32, #tpu.memory_space<vmem>>, vector<8x8xf32>
    %c0_2 = arith.constant 0 : index
    %c64 = arith.constant 64 : index
    %9 = vector.load %arg11[%c0_2, %c64] : memref<8x96xf32, #tpu.memory_space<vmem>>, vector<8x8xf32>
    %cst = arith.constant dense<0.000000e+00> : vector<8x8xf32>
    %10 = tpu.matmul %7, %8, %cst {dimension_numbers = #tpu.dot_dimension_numbers<[1], [1], [0], [0], [0, 0, 1, 0], [], []>} : vector<8x8xf32>, vector<8x8xf32>, vector<8x8xf32> -> vector<8x8xf32>
    %cst_3 = arith.constant dense<0xFF800000> : vector<8xf32>
    %11 = vector.multi_reduction <maximumf>, %10, %cst_3 [1] : vector<8x8xf32> to vector<8xf32>
    %12 = vector.shape_cast %11 : vector<8xf32> to vector<8x1xf32>
    %13 = vector.broadcast %12 : vector<8x1xf32> to vector<8x8xf32>
    %14 = arith.subf %10, %13 : vector<8x8xf32>
    %15 = math.exp %14 : vector<8x8xf32>
    %cst_4 = arith.constant dense<0.000000e+00> : vector<8xf32>
    %16 = vector.multi_reduction <add>, %15, %cst_4 [1] : vector<8x8xf32> to vector<8xf32>
    %17 = vector.shape_cast %16 : vector<8xf32> to vector<8x1xf32>
    %18 = tpu.reciprocal %17 : vector<8x1xf32> -> vector<8x1xf32>
    %19 = vector.broadcast %18 : vector<8x1xf32> to vector<8x8xf32>
    %20 = arith.mulf %15, %19 : vector<8x8xf32>
    %cst_5 = arith.constant dense<0.000000e+00> : vector<8x8xf32>
    %21 = tpu.matmul %20, %9, %cst_5 {dimension_numbers = #tpu.dot_dimension_numbers<[1], [0], [0], [1], [0, 0, 1, 1], [], []>} : vector<8x8xf32>, vector<8x8xf32>, vector<8x8xf32> -> vector<8x8xf32>
    %c0_6 = arith.constant 0 : index
    %c0_7 = arith.constant 0 : index
    %22 = vector.load %arg12[%c0_6, %c0_7] : memref<8x32xf32, #tpu.memory_space<vmem>>, vector<8x8xf32>
    tpu.vector_store %arg12[%c0_6, %c0_7], %21 {strides = array<i32>} : memref<8x32xf32, #tpu.memory_space<vmem>>, vector<8x8xf32>,
    %23 = vector.extract_strided_slice %6 {offsets = [0, 8], sizes = [8, 8], strides = [1, 1]} : vector<8x32xf32> to vector<8x8xf32>
    %c0_8 = arith.constant 0 : index
    %c40 = arith.constant 40 : index
    %24 = vector.load %arg11[%c0_8, %c40] : memref<8x96xf32, #tpu.memory_space<vmem>>, vector<8x8xf32>
    %c0_9 = arith.constant 0 : index
    %c72 = arith.constant 72 : index
    %25 = vector.load %arg11[%c0_9, %c72] : memref<8x96xf32, #tpu.memory_space<vmem>>, vector<8x8xf32>
    %cst_10 = arith.constant dense<0.000000e+00> : vector<8x8xf32>
    %26 = tpu.matmul %23, %24, %cst_10 {dimension_numbers = #tpu.dot_dimension_numbers<[1], [1], [0], [0], [0, 0, 1, 0], [], []>} : vector<8x8xf32>, vector<8x8xf32>, vector<8x8xf32> -> vector<8x8xf32>
    %cst_11 = arith.constant dense<0xFF800000> : vector<8xf32>
    %27 = vector.multi_reduction <maximumf>, %26, %cst_11 [1] : vector<8x8xf32> to vector<8xf32>
    %28 = vector.shape_cast %27 : vector<8xf32> to vector<8x1xf32>
    %29 = vector.broadcast %28 : vector<8x1xf32> to vector<8x8xf32>
    %30 = arith.subf %26, %29 : vector<8x8xf32>
    %31 = math.exp %30 : vector<8x8xf32>
    %cst_12 = arith.constant dense<0.000000e+00> : vector<8xf32>
    %32 = vector.multi_reduction <add>, %31, %cst_12 [1] : vector<8x8xf32> to vector<8xf32>
    %33 = vector.shape_cast %32 : vector<8xf32> to vector<8x1xf32>
    %34 = tpu.reciprocal %33 : vector<8x1xf32> -> vector<8x1xf32>
    %35 = vector.broadcast %34 : vector<8x1xf32> to vector<8x8xf32>
    %36 = arith.mulf %31, %35 : vector<8x8xf32>
    %cst_13 = arith.constant dense<0.000000e+00> : vector<8x8xf32>
    %37 = tpu.matmul %36, %25, %cst_13 {dimension_numbers = #tpu.dot_dimension_numbers<[1], [0], [0], [1], [0, 0, 1, 1], [], []>} : vector<8x8xf32>, vector<8x8xf32>, vector<8x8xf32> -> vector<8x8xf32>
    %c0_14 = arith.constant 0 : index
    %c8 = arith.constant 8 : index
    %38 = vector.load %arg12[%c0_14, %c8] : memref<8x32xf32, #tpu.memory_space<vmem>>, vector<8x8xf32>
    tpu.vector_store %arg12[%c0_14, %c8], %37 {strides = array<i32>} : memref<8x32xf32, #tpu.memory_space<vmem>>, vector<8x8xf32>,
    %39 = vector.extract_strided_slice %6 {offsets = [0, 16], sizes = [8, 8], strides = [1, 1]} : vector<8x32xf32> to vector<8x8xf32>
    %c0_15 = arith.constant 0 : index
    %c48 = arith.constant 48 : index
    %40 = vector.load %arg11[%c0_15, %c48] : memref<8x96xf32, #tpu.memory_space<vmem>>, vector<8x8xf32>
    %c0_16 = arith.constant 0 : index
    %c80 = arith.constant 80 : index
    %41 = vector.load %arg11[%c0_16, %c80] : memref<8x96xf32, #tpu.memory_space<vmem>>, vector<8x8xf32>
    %cst_17 = arith.constant dense<0.000000e+00> : vector<8x8xf32>
    %42 = tpu.matmul %39, %40, %cst_17 {dimension_numbers = #tpu.dot_dimension_numbers<[1], [1], [0], [0], [0, 0, 1, 0], [], []>} : vector<8x8xf32>, vector<8x8xf32>, vector<8x8xf32> -> vector<8x8xf32>
    %cst_18 = arith.constant dense<0xFF800000> : vector<8xf32>
    %43 = vector.multi_reduction <maximumf>, %42, %cst_18 [1] : vector<8x8xf32> to vector<8xf32>
    %44 = vector.shape_cast %43 : vector<8xf32> to vector<8x1xf32>
    %45 = vector.broadcast %44 : vector<8x1xf32> to vector<8x8xf32>
    %46 = arith.subf %42, %45 : vector<8x8xf32>
    %47 = math.exp %46 : vector<8x8xf32>
    %cst_19 = arith.constant dense<0.000000e+00> : vector<8xf32>
    %48 = vector.multi_reduction <add>, %47, %cst_19 [1] : vector<8x8xf32> to vector<8xf32>
    %49 = vector.shape_cast %48 : vector<8xf32> to vector<8x1xf32>
    %50 = tpu.reciprocal %49 : vector<8x1xf32> -> vector<8x1xf32>
    %51 = vector.broadcast %50 : vector<8x1xf32> to vector<8x8xf32>
    %52 = arith.mulf %47, %51 : vector<8x8xf32>
    %cst_20 = arith.constant dense<0.000000e+00> : vector<8x8xf32>
    %53 = tpu.matmul %52, %41, %cst_20 {dimension_numbers = #tpu.dot_dimension_numbers<[1], [0], [0], [1], [0, 0, 1, 1], [], []>} : vector<8x8xf32>, vector<8x8xf32>, vector<8x8xf32> -> vector<8x8xf32>
    %c0_21 = arith.constant 0 : index
    %c16 = arith.constant 16 : index
    %54 = vector.load %arg12[%c0_21, %c16] : memref<8x32xf32, #tpu.memory_space<vmem>>, vector<8x8xf32>
    tpu.vector_store %arg12[%c0_21, %c16], %53 {strides = array<i32>} : memref<8x32xf32, #tpu.memory_space<vmem>>, vector<8x8xf32>,
    %55 = vector.extract_strided_slice %6 {offsets = [0, 24], sizes = [8, 8], strides = [1, 1]} : vector<8x32xf32> to vector<8x8xf32>
    %c0_22 = arith.constant 0 : index
    %c56 = arith.constant 56 : index
    %56 = vector.load %arg11[%c0_22, %c56] : memref<8x96xf32, #tpu.memory_space<vmem>>, vector<8x8xf32>
    %c0_23 = arith.constant 0 : index
    %c88 = arith.constant 88 : index
    %57 = vector.load %arg11[%c0_23, %c88] : memref<8x96xf32, #tpu.memory_space<vmem>>, vector<8x8xf32>
    %cst_24 = arith.constant dense<0.000000e+00> : vector<8x8xf32>
    %58 = tpu.matmul %55, %56, %cst_24 {dimension_numbers = #tpu.dot_dimension_numbers<[1], [1], [0], [0], [0, 0, 1, 0], [], []>} : vector<8x8xf32>, vector<8x8xf32>, vector<8x8xf32> -> vector<8x8xf32>
    %cst_25 = arith.constant dense<0xFF800000> : vector<8xf32>
    %59 = vector.multi_reduction <maximumf>, %58, %cst_25 [1] : vector<8x8xf32> to vector<8xf32>
    %60 = vector.shape_cast %59 : vector<8xf32> to vector<8x1xf32>
    %61 = vector.broadcast %60 : vector<8x1xf32> to vector<8x8xf32>
    %62 = arith.subf %58, %61 : vector<8x8xf32>
    %63 = math.exp %62 : vector<8x8xf32>
    %cst_26 = arith.constant dense<0.000000e+00> : vector<8xf32>
    %64 = vector.multi_reduction <add>, %63, %cst_26 [1] : vector<8x8xf32> to vector<8xf32>
    %65 = vector.shape_cast %64 : vector<8xf32> to vector<8x1xf32>
    %66 = tpu.reciprocal %65 : vector<8x1xf32> -> vector<8x1xf32>
    %67 = vector.broadcast %66 : vector<8x1xf32> to vector<8x8xf32>
    %68 = arith.mulf %63, %67 : vector<8x8xf32>
    %cst_27 = arith.constant dense<0.000000e+00> : vector<8x8xf32>
    %69 = tpu.matmul %68, %57, %cst_27 {dimension_numbers = #tpu.dot_dimension_numbers<[1], [0], [0], [1], [0, 0, 1, 1], [], []>} : vector<8x8xf32>, vector<8x8xf32>, vector<8x8xf32> -> vector<8x8xf32>
    %c0_28 = arith.constant 0 : index
    %c24 = arith.constant 24 : index
    %70 = vector.load %arg12[%c0_28, %c24] : memref<8x32xf32, #tpu.memory_space<vmem>>, vector<8x8xf32>
    tpu.vector_store %arg12[%c0_28, %c24], %69 {strides = array<i32>} : memref<8x32xf32, #tpu.memory_space<vmem>>, vector<8x8xf32>,
    %c0_29 = arith.constant 0 : index
    %c0_30 = arith.constant 0 : index
    %71 = vector.load %arg12[%c0_29, %c0_30] : memref<8x32xf32, #tpu.memory_space<vmem>>, vector<8x32xf32>
    %c0_31 = arith.constant 0 : index
    %c0_32 = arith.constant 0 : index
    %72 = vector.load %arg6[%c0_31, %c0_32] : memref<32x32xf32, #tpu.memory_space<vmem>>, vector<32x32xf32>
    %cst_33 = arith.constant dense<0.000000e+00> : vector<8x32xf32>
    %73 = tpu.matmul %71, %72, %cst_33 {dimension_numbers = #tpu.dot_dimension_numbers<[1], [0], [0], [1], [0, 0, 1, 1], [], []>} : vector<8x32xf32>, vector<32x32xf32>, vector<8x32xf32> -> vector<8x32xf32>
    %c0_34 = arith.constant 0 : index
    %c0_35 = arith.constant 0 : index
    %74 = vector.load %arg7[%c0_34, %c0_35] : memref<1x32xf32, #tpu.memory_space<vmem>>, vector<1x32xf32>
    %75 = vector.broadcast %74 : vector<1x32xf32> to vector<8x32xf32>
    %76 = arith.addf %73, %75 : vector<8x32xf32>
    %c0_36 = arith.constant 0 : index
    %c0_37 = arith.constant 0 : index
    %c0_38 = arith.constant 0 : index
    %77 = vector.load %arg3[%c0_36, %c0_37, %c0_38] : memref<1x8x32xf32, #tpu.memory_space<vmem>>, vector<1x8x32xf32>
    %78 = vector.shape_cast %77 : vector<1x8x32xf32> to vector<8x32xf32>
    %79 = arith.addf %76, %78 : vector<8x32xf32>
    %cst_39 = arith.constant dense<0.000000e+00> : vector<8xf32>
    %80 = vector.multi_reduction <add>, %79, %cst_39 [1] : vector<8x32xf32> to vector<8xf32>
    %81 = vector.shape_cast %80 : vector<8xf32> to vector<8x1xf32>
    %cst_40 = arith.constant 3.200000e+01 : f32
    %82 = vector.broadcast %cst_40 : f32 to vector<8x1xf32>
    %83 = arith.divf %81, %82 : vector<8x1xf32>
    %84 = vector.broadcast %83 : vector<8x1xf32> to vector<8x32xf32>
    %85 = arith.subf %79, %84 : vector<8x32xf32>
    %86 = arith.mulf %85, %85 : vector<8x32xf32>
    %cst_41 = arith.constant dense<0.000000e+00> : vector<8xf32>
    %87 = vector.multi_reduction <add>, %86, %cst_41 [1] : vector<8x32xf32> to vector<8xf32>
    %88 = vector.shape_cast %87 : vector<8xf32> to vector<8x1xf32>
    %cst_42 = arith.constant 3.200000e+01 : f32
    %89 = vector.broadcast %cst_42 : f32 to vector<8x1xf32>
    %90 = arith.divf %88, %89 : vector<8x1xf32>
    %cst_43 = arith.constant 9.99999996E-13 : f32
    %91 = vector.broadcast %cst_43 : f32 to vector<8x1xf32>
    %92 = arith.addf %90, %91 : vector<8x1xf32>
    %93 = math.rsqrt %92 : vector<8x1xf32>
    %94 = vector.broadcast %93 : vector<8x1xf32> to vector<8x32xf32>
    %95 = arith.mulf %85, %94 : vector<8x32xf32>
    %c0_44 = arith.constant 0 : index
    %c0_45 = arith.constant 0 : index
    %96 = vector.load %arg8[%c0_44, %c0_45] : memref<1x32xf32, #tpu.memory_space<vmem>>, vector<1x32xf32>
    %97 = vector.broadcast %96 : vector<1x32xf32> to vector<8x32xf32>
    %98 = arith.mulf %97, %95 : vector<8x32xf32>
    %c0_46 = arith.constant 0 : index
    %c0_47 = arith.constant 0 : index
    %99 = vector.load %arg9[%c0_46, %c0_47] : memref<1x32xf32, #tpu.memory_space<vmem>>, vector<1x32xf32>
    %100 = vector.broadcast %99 : vector<1x32xf32> to vector<8x32xf32>
    %101 = arith.addf %98, %100 : vector<8x32xf32>
    %c0_48 = arith.constant 0 : index
    %c0_49 = arith.constant 0 : index
    %c0_50 = arith.constant 0 : index
    %102 = vector.load %arg10[%c0_48, %c0_49, %c0_50] : memref<1x8x32xf32, #tpu.memory_space<vmem>>, vector<1x8x32xf32>
    %103 = vector.shape_cast %102 : vector<1x8x32xf32> to vector<8x32xf32>
    %104 = vector.shape_cast %101 : vector<8x32xf32> to vector<1x8x32xf32>
    tpu.vector_store %arg10[%c0_48, %c0_49, %c0_50], %104 {strides = array<i32>} : memref<1x8x32xf32, #tpu.memory_space<vmem>>, vector<1x8x32xf32>,
    return
  }
  func.func @transform_0(%arg0: i32, %arg1: i32) -> (i32, i32, i32) {
    %c0_i32 = arith.constant 0 : i32
    %c0_i32_0 = arith.constant 0 : i32
    %c0_i32_1 = arith.constant 0 : i32
    return %arg0, %c0_i32, %c0_i32_0 : i32, i32, i32
  }
  func.func @transform_1(%arg0: i32, %arg1: i32) -> (i32, i32, i32) {
    %c0_i32 = arith.constant 0 : i32
    %c0_i32_0 = arith.constant 0 : i32
    return %arg0, %arg1, %c0_i32 : i32, i32, i32
  }
  func.func @transform_2(%arg0: i32, %arg1: i32) -> (i32, i32) {
    %c0_i32 = arith.constant 0 : i32
    %c0_i32_0 = arith.constant 0 : i32
    %c0_i32_1 = arith.constant 0 : i32
    return %c0_i32, %c0_i32_0 : i32, i32
  }
  func.func @transform_3(%arg0: i32, %arg1: i32) -> (i32, i32) {
    %c0_i32 = arith.constant 0 : i32
    %c0_i32_0 = arith.constant 0 : i32
    %c0_i32_1 = arith.constant 0 : i32
    return %c0_i32, %c0_i32_0 : i32, i32
  }
  func.func @transform_4(%arg0: i32, %arg1: i32) -> (i32, i32) {
    %c0_i32 = arith.constant 0 : i32
    %c0_i32_0 = arith.constant 0 : i32
    %c0_i32_1 = arith.constant 0 : i32
    return %c0_i32, %c0_i32_0 : i32, i32
  }
  func.func @transform_5(%arg0: i32, %arg1: i32) -> (i32, i32) {
    %c0_i32 = arith.constant 0 : i32
    %c0_i32_0 = arith.constant 0 : i32
    %c0_i32_1 = arith.constant 0 : i32
    return %c0_i32, %c0_i32_0 : i32, i32
  }
  func.func @transform_6(%arg0: i32, %arg1: i32) -> (i32, i32) {
    %c0_i32 = arith.constant 0 : i32
    %c0_i32_0 = arith.constant 0 : i32
    %c0_i32_1 = arith.constant 0 : i32
    return %c0_i32, %c0_i32_0 : i32, i32
  }
  func.func @transform_7(%arg0: i32, %arg1: i32) -> (i32, i32) {
    %c0_i32 = arith.constant 0 : i32
    %c0_i32_0 = arith.constant 0 : i32
    %c0_i32_1 = arith.constant 0 : i32
    return %c0_i32, %c0_i32_0 : i32, i32
  }
  func.func @transform_8(%arg0: i32, %arg1: i32) -> (i32, i32, i32) {
    %c0_i32 = arith.constant 0 : i32
    %c0_i32_0 = arith.constant 0 : i32
    return %arg0, %arg1, %c0_i32 : i32, i32, i32
  }
}

</mosaic_0001>

<bundles_post_ra>
// kernel: tpu_custom_call.1
= control target key start
LH: loop header
LB: loop body
LE: loop exit
PB: predicated region body
PF: predicated region fallthrough
CT: control target
= control target key end

     0   :  { %s2363_s0 = inlined_call_operand.hbm [shape: f32[2,8,32], index: 0, kind: input, shape index: {}]   ;;  %s2364_s1 = inlined_call_operand.hbm [shape: f32[2,8,32], index: 1, kind: input, shape index: {}]   ;;  %s2365_s2 = inlined_call_operand.hbm [shape: f32[32,96], index: 2, kind: input, shape index: {}]   ;;  %s2366_s3 = inlined_call_operand.vmem [shape: f32[1,96], index: 3, kind: input, shape index: {}]   ;;  %s2367_s4 = inlined_call_operand.hbm [shape: f32[32,32], index: 4, kind: input, shape index: {}]   ;;  %s2368_s5 = inlined_call_operand.vmem [shape: f32[1,32], index: 5, kind: input, shape index: {}]   ;;  %s2369_s6 = inlined_call_operand.vmem [shape: f32[1,32], index: 6, kind: input, shape index: {}]   ;;  %s2370_s7 = inlined_call_operand.vmem [shape: f32[1,32], index: 7, kind: input, shape index: {}]   ;;  %s2371_s8 = inlined_call_operand.hbm [shape: f32[2,8,32], index: 8, kind: output, shape index: {}]  }
   0x1   :  { %2380 = sst [smem:[#allocation23_spill]] %s2365_s2 }
   0x2   :  { %2381 = sst [smem:[#allocation24_spill]] %s2367_s4 }
   0x3   :  { %13 = vsyncpa [#allocation5], 0 }
   0x4   :  { %15 = vsyncpa [#allocation5 + $0x1], 0 }
   0x5   :  { %16 = vsyncpa [#allocation8], 0 }
   0x6   :  { %18 = vsyncpa [#allocation8 + $0x1], 0 }
   0x7   :  { %19 = vsyncpa [#allocation11], 0 }
   0x8   :  { %20 = vsyncpa [#allocation6], 0 }
   0x9   :  { %22 = vsyncpa [#allocation6 + $0x1], 0  ;;  %s1988_s27 = smov 0   ;;  %s1990_s28 = smov 0  }
   0xa   :  { %s1992_s29 = smov 0   ;;  %s1994_s30 = smov 0  }
   0xb   :  { %s1996_s9 = smov 0   ;;  %s1998_s10 = smov 0  }
   0xc LB: > { %2382 = sst [smem:[#allocation18_spill]] %s1897_s27  ;;  %s2019_s11 = sadd.s32 4294967295, %s1917_s10   ;;  %s1917_s10 = sphi %s1998_s10, %s28_s10   ;;  %s1913_s9 = sphi %s1996_s9, %s2409_s9   ;;  %s1909_s30 = sphi %s1994_s30, %s2408_s30   ;;  %s1905_s29 = sphi %s1992_s29, %s2412_s29   ;;  %s1901_s28 = sphi %s1990_s28, %s2411_s28   ;;  %s1897_s27 = sphi %s1988_s27, %s2410_s27  }
   0xd   : > { %2383 = sst [smem:[#allocation19_spill]] %s1913_s9  ;;  %s1445_s12 = sadd.s32 4294967294, %s1917_s10  }
   0xe   : > { %p60_p0 = scmp.ne.s32.totalorder %s1901_s28, %s1897_s27  ;;  %p2372_p1 = scmp.eq.s32.totalorder %s2019_s11, 0 }
   0xf   : > { %p246_p3 = scmp.eq.s32.totalorder %s1445_s12, 1  ;;  %p1446_p5 = scmp.ge.s32.totalorder %s1917_s10, 1 }
  0x10   : > { %p2028_p4 = por %p2372_p1, %p60_p0  ;;  %p253_p7 = scmp.lt.s32.totalorder %s1917_s10, 3 }
  0x11   : > { %p2033_p6 = por %p246_p3, %p60_p0  ;;  %s1919_s16 = smov [#allocation9]  }
  0x12   : > { %s2384_s13 = scalar_select %p2028_p4, 1, 0 }
  0x13   : > { %s2385_s14 = scalar_select %p2033_p6, 1, 0 }
  0x14   : > { %p2038_p8 = pnand %p1446_p5, %p253_p7  ;;  %s265_s17 = sshll.u32 %s1919_s16, 4  ;;  %s2042_s17 = int_to_ptr.vmem [resolvable:$true] %s265_s17 }
  0x15   : > { %2386 = sst [smem:[#allocation20_spill]] %s2385_s14  ;;  %s1920_s19 = smov [#allocation10]  }
  0x16   : > { %s2387_s15 = scalar_select %p2038_p8, 1, 0 }
  0x17   : > { %p1596_p9 = pneg %p2038_p8  ;;  %s281_s20 = sshll.u32 %s1920_s19, 4  ;;  %s2053_s20 = int_to_ptr.vmem [resolvable:$true] %s281_s20 }
  0x18   : > { %s2389_s2 = sld [smem:[#allocation23_spill]] }
  0x19   : > { %p2049_p11 = pnand %p1596_p9, %p2372_p1 }
  0x1b   : > { %p1709_p13 = pneg %p2049_p11 }
  0x1e   : > { %s1707_s23 = scalar_lea.hbm %s2389_s2, 512 }
  0x1f   : > { %p1708_p12 = scmp.ne.s32.totalorder %s2389_s2, %s1707_s23  ;;  %p1714_p5 = scmp.lt.u32.totalorder %s1707_s23, %s2389_s2 }
  0x21   : > { %p1710_p0 = pnand %p1709_p13, %p1708_p12 }
  0x23   : > { %p1711_p3 = pneg %p1710_p0 }
  0x25   : > { %p1716_p7 = pnand %p1714_p5, %p1711_p3 }
  0x27   : > { %1719 = shalt.err (!%p1716_p7)
}
  0x28   : > { %s1720_s16 = scalar_lea.vmem %s2042_s17, 512  ;;  %p1728_p2 = scmp.lt.s32.totalorder %s2042_s17, %s2042_s17 }
  0x29   : > { %p1721_p9 = scmp.ne.s32.totalorder %s2042_s17, %s1720_s16  ;;  %p1729_p12 = scmp.lt.s32.totalorder %s1720_s16, %s1720_s16 }
  0x2b   : > { %p1723_p10 = pnand %p1721_p9, %p1709_p13  ;;  %p1730_p0 = por %p1729_p12, %p1728_p2 }
  0x2d   : > { %p1724_p1 = pneg %p1723_p10 }
  0x2f   : > { %p1731_p6 = pnand %p1730_p0, %p1724_p1 }
  0x31   : > { %1734 = shalt.err (!%p1731_p6)
}
  0x32   : > { %s1921_s19 = smov 128   ;;  %s1922_s21 = smov 8  }
  0x33   : > { %1599 = dma.hbm_to_vmem [thread:$0]  (!%p2049_p11), %s2389_s2, 512, %s2042_s17, [#allocation8], %s1921_s19, %s1921_s19, %s1922_s21  }
  0x34   : > { %s2390_s4 = sld [smem:[#allocation24_spill]] }
  0x3a   : > { %s1735_s26 = scalar_lea.hbm %s2390_s4, 512 }
  0x3b   : > { %p1736_p2 = scmp.ne.s32.totalorder %s2390_s4, %s1735_s26  ;;  %p1742_p10 = scmp.lt.u32.totalorder %s1735_s26, %s2390_s4 }
  0x3d   : > { %p1738_p1 = pnand %p1736_p2, %p1709_p13 }
  0x3f   : > { %p1739_p6 = pneg %p1738_p1 }
  0x41   : > { %p1744_p3 = pnand %p1742_p10, %p1739_p6 }
  0x43   : > { %1747 = shalt.err (!%p1744_p3)
}
  0x44   : > { %s1748_s17 = scalar_lea.vmem %s2053_s20, 512  ;;  %p1756_p12 = scmp.lt.s32.totalorder %s2053_s20, %s2053_s20 }
  0x45   : > { %p1749_p5 = scmp.ne.s32.totalorder %s2053_s20, %s1748_s17  ;;  %p1757_p0 = scmp.lt.s32.totalorder %s1748_s17, %s1748_s17 }
  0x47   : > { %p1751_p7 = pnand %p1749_p5, %p1709_p13  ;;  %p1758_p2 = por %p1757_p0, %p1756_p12 }
  0x49   : > { %p1752_p9 = pneg %p1751_p7 }
  0x4b   : > { %p1759_p1 = pnand %p1758_p2, %p1752_p9 }
  0x4d   : > { %1762 = shalt.err (!%p1759_p1)
}
  0x4e   : > { %1602 = dma.hbm_to_vmem [thread:$0]  (!%p2049_p11), %s2390_s4, 512, %s2053_s20, [#allocation11], %s1921_s19, %s1921_s19, %s1922_s21  }
  0x4f   : > { %s40_s22 = sadd.s32 1, %s1913_s9  ;;  %s47_s23 = sadd.s32 1, %s1905_s29 }
  0x50   : > { %p42_p13 = scmp.ge.s32.totalorder %s40_s22, 2  ;;  %p54_p6 = scmp.ne.s32.totalorder %s1905_s29, %s1901_s28 }
  0x51   : > { %p55_p10 = scmp.eq.s32.totalorder %s1917_s10, 0  ;;  %p1616_p3 = scmp.lt.s32.totalorder %s1917_s10, 2 }
  0x52   : > { %s2414_s22 = smov (%p42_p13, %s40_s22), 0  ;;  %p2392_p7 = scmp.eq.s32.totalorder %s2019_s11, 1 }
  0x53   : > { %2391 = sst [smem:[#allocation21_spill]] %s2414_s22  ;;  %p56_p5 = por %p55_p10, %p54_p6 }
  0x54   : > { %p2117_p9 = por %p2392_p7, %p54_p6  ;;  %s44_s24 = ssub.s32 %s1913_s9, %s2414_s22 }
  0x55   : > { %s304_s25 = sand.u32 1, %s1905_s29   ;;  %p45_p12 = scmp.eq.s32.totalorder %s44_s24, 0 }
  0x56   : > { %s2393_s18 = scalar_select %p2117_p9, 1, 0 }
  0x57   : > { %s2124_s20 = sshll.u32 %s304_s25, 3  ;;  %s1451_s19 = sshll.u32 %s1913_s9, 7 }
  0x58   : > { %s2128_s21 = scalar_select %p45_p12, %s1905_s29, %s47_s23  }
  0x59   : > { %s2133_s16 = scalar_lea.hbm %s2363_s0, %s1451_s19  ;;  %s308_s17 = scalar_lea.vmem [#allocation4], %s2124_s20 }
  0x5a   : > { %2394 = sst [smem:[#allocation22_spill]] %s2128_s21  ;;  %s315_s27 = sshll.u32 %s308_s17, 4  ;;  %s2142_s27 = int_to_ptr.vmem [resolvable:$true] %s315_s27 }
  0x5b   : > { %p2138_p11 = pnand %p1616_p3, %p56_p5  ;;  %s2147_s26 = scalar_lea.hbm %s2364_s1, %s1451_s19 }
  0x5c   : > { %s305_s12 = scalar_lea.sflag [#allocation5], %s304_s25  ;;  %s1763_s2 = scalar_lea.hbm %s2133_s16, 128 }
  0x5d   : > { %p1764_p0 = scmp.ne.s32.totalorder %s2133_s16, %s1763_s2  ;;  %p1765_p2 = pneg %p2138_p11 }
  0x5e   : > { %s1768_s22 = scalar_lea.hbm %s2363_s0, 256  ;;  %p1769_p6 = scmp.lt.u32.totalorder %s2133_s16, %s2363_s0 }
  0x5f   : > { %p1766_p1 = pnand %p1765_p2, %p1764_p0  ;;  %p1770_p10 = scmp.lt.u32.totalorder %s1768_s22, %s1763_s2 }
  0x60   : > { %p1772_p5 = scmp.lt.u32.totalorder %s1763_s2, %s2133_s16 }
  0x61   : > { %p1767_p13 = pneg %p1766_p1  ;;  %p1771_p3 = por %p1770_p10, %p1769_p6 }
  0x63   : > { %p1773_p7 = por %p1772_p5, %p1771_p3 }
  0x65   : > { %p1774_p12 = pnand %p1773_p7, %p1767_p13 }
  0x67   : > { %1777 = shalt.err (!%p1774_p12)
}
  0x68   : > { %s1778_s25 = scalar_lea.vmem %s2142_s27, 128  ;;  %s1923_s4 = smov [#allocation4]  }
  0x69   : > { %p1779_p0 = scmp.ne.s32.totalorder %s2142_s27, %s1778_s25  ;;  %s1783_s19 = sshll.u32 %s1923_s4, 4  ;;  %s1784_s19 = int_to_ptr.vmem [resolvable:$false] %s1783_s19 }
  0x6a   : > { %s1785_s9 = scalar_lea.vmem %s1784_s19, 256  ;;  %p1786_p4 = scmp.lt.s32.totalorder %s2142_s27, %s1784_s19 }
  0x6b   : > { %p1781_p1 = pnand %p1779_p0, %p1765_p2  ;;  %p1787_p6 = scmp.lt.s32.totalorder %s1785_s9, %s1778_s25 }
  0x6d   : > { %p1782_p9 = pneg %p1781_p1  ;;  %p1788_p10 = por %p1787_p6, %p1786_p4 }
  0x6f   : > { %p1789_p3 = pnand %p1788_p10, %p1782_p9 }
  0x71   : > { %1792 = shalt.err (!%p1789_p3)
}
  0x72   : > { %1606 = dma.hbm_to_vmem [thread:$0]  (!%p2138_p11), %s2133_s16, 128, %s2142_s27, %s305_s12  }
  0x73   : > { %s322_s2 = sand.u32 1, %s1917_s10   ;;  %s326_s22 = scalar_lea.vmem [#allocation7], %s2124_s20 }
  0x74   : > { %s334_s21 = sshll.u32 %s326_s22, 4  ;;  %s323_s23 = scalar_lea.sflag [#allocation8], %s322_s2  ;;  %s335_s21 = int_to_ptr.vmem [resolvable:$true] %s334_s21 }
  0x75   : > { %s1793_s24 = scalar_lea.hbm %s2147_s26, 128  ;;  %s1798_s4 = scalar_lea.hbm %s2364_s1, 256 }
  0x76   : > { %p1794_p4 = scmp.ne.s32.totalorder %s2147_s26, %s1793_s24  ;;  %p1799_p5 = scmp.lt.u32.totalorder %s2147_s26, %s2364_s1 }
  0x77   : > { %p1800_p7 = scmp.lt.u32.totalorder %s1798_s4, %s1793_s24  ;;  %p1802_p0 = scmp.lt.u32.totalorder %s1793_s24, %s2147_s26 }
  0x78   : > { %p1796_p9 = pnand %p1794_p4, %p1765_p2 }
  0x79   : > { %p1801_p12 = por %p1800_p7, %p1799_p5 }
  0x7a   : > { %p1797_p13 = pneg %p1796_p9 }
  0x7b   : > { %p1803_p1 = por %p1802_p0, %p1801_p12 }
  0x7d   : > { %p1804_p6 = pnand %p1803_p1, %p1797_p13 }
  0x7f   : > { %1807 = shalt.err (!%p1804_p6)
}
  0x80   : > { %s1808_s20 = scalar_lea.vmem %s335_s21, 128  ;;  %s1924_s16 = smov [#allocation7]  }
  0x81   : > { %p1809_p10 = scmp.ne.s32.totalorder %s335_s21, %s1808_s20  ;;  %s1813_s27 = sshll.u32 %s1924_s16, 4  ;;  %s1814_s27 = int_to_ptr.vmem [resolvable:$false] %s1813_s27 }
  0x82   : > { %s1815_s12 = scalar_lea.vmem %s1814_s27, 256  ;;  %p1816_p9 = scmp.lt.s32.totalorder %s335_s21, %s1814_s27 }
  0x83   : > { %p1811_p3 = pnand %p1809_p10, %p1765_p2  ;;  %p1817_p8 = scmp.lt.s32.totalorder %s1815_s12, %s1808_s20 }
  0x85   : > { %p1812_p4 = pneg %p1811_p3  ;;  %p1818_p5 = por %p1817_p8, %p1816_p9 }
  0x87   : > { %p1819_p7 = pnand %p1818_p5, %p1812_p4 }
  0x89   : > { %1822 = shalt.err (!%p1819_p7)
}
  0x8a   : > { %1609 = dma.hbm_to_vmem [thread:$0]  (!%p2138_p11), %s2147_s26, 128, %s335_s21, %s323_s23  }
  0x8b   : > { %p2396_p13 = scmp.ne.s32.totalorder %s2387_s15, 0 }
  0x8c   : > { %s2198_s2 = sand.u32 (!%p2396_p13), 1, %s1901_s28   ;;  %p2397_p8 = scmp.ne.s32.totalorder (!%p2396_p13), %s2384_s13, 0 }
  0x8d   : > { %343 = sbr.rel (%p2396_p13) target bundleno = 2492 (0x9bc), region = 52  ;;  %s2201_s22 = sshll.u32 (!%p2396_p13), %s2198_s2, 3 }
  0x8e   : > { %s346_s24 = scalar_lea.sflag (!%p2396_p13), [#allocation5], %s2198_s2  ;;  %s349_s17 = scalar_lea.vmem (!%p2396_p13), [#allocation4], %s2201_s22 }
  0x94   : > { %1876 = dma.done.wait (%p2397_p8), %s346_s24, 128  }
  0x95   : > { %1878 = vsyncadd (%p2397_p8), %s346_s24, 4294967168  ;;  %s354_s15 = sand.u32 1, %s2019_s11   ;;  %s358_s26 = scalar_lea.vmem [#allocation7], %s2201_s22 }
  0x96   : > { %s355_s14 = scalar_lea.sflag [#allocation8], %s354_s15 }
  0x97   : > { %1880 = dma.done.wait (%p2397_p8), %s355_s14, 128  }
  0x98   : > { %1882 = vsyncadd (%p2397_p8), %s355_s14, 4294967168  ;;  %p2398_p11 = scmp.eq.s32.totalorder %s2019_s11, 0 }
  0x9a   : > { %1884 = dma.done.wait (%p2398_p11), [#allocation8], 512   ;;  %p2399_p2 = pmov %p2398_p11 }
  0x9c   : > { %1886 = vsyncadd (%p2399_p2), [#allocation8], 4294966784  ;;  %p2400_p12 = pmov %p2399_p2 }
  0x9d   : > { %p2401_p0 = pmov %p2399_p2 }
  0x9e   : > { %1888 = dma.done.wait (%p2400_p12), [#allocation11], 512  }
  0x9f   : > { %1890 = vsyncadd (%p2401_p0), [#allocation11], 4294966784  ;;  %v1925_v0 = vmov 0.0|0.0   ;;  %vm1926_vm0 = vmmov 0   ;;  %v1927_v1 = vmov 0.0   ;;  %v409_v2 = vld [vmem:[#allocation9] sm:$0xff] }
  0xa0   : > { %1570 = vmatprep.subr.bf16.mxu0 %v1925_v0  ;;  %1516 = vmatprep.mubr.msk.f32.mxu0 %vm1926_vm0, %v1927_v1  ;;  %v410_v3 = vld [vmem:[#allocation9 + $0x8] sm:$0xff]  ;;  %v411_v4 = vld [vmem:[#allocation9 + $0x10] sm:$0xff]  ;;  %v412_v6 = vld [vmem:[#allocation9 + $0x18] sm:$0xff]  ;;  %vm420_vm1 = vcmask 261120   ;;  %vm494_vm2 = vcmask 785408   ;;  %s1928_s21 = smov 64  }
  0xa1   : > { %1519 = vmatprep.subr.mxu1 %v1927_v1  ;;  %1521 = vmatprep.mubr.msk.f32.mxu1 %vm1926_vm0, %v1927_v1  ;;  %v1571_v5 = vpack.c.bf16 %v410_v3, %v409_v2  ;;  %v1574_v7 = vpack.c.bf16 %v412_v6, %v411_v4  ;;  %v408_v8 = vld [vmem:[%s349_s17] sm:$0xff]  ;;  %v1460_v9 = vld [vmem:[%s2366_s3] ss:$0 sm:$0xff]  ;;  %s1929_s23 = smov 96   ;;  %s1930_s25 = smov 88   ;;  %vm503_vm3 = vcmask 64512  }
  0xa2   : > { %s1931_s4 = smov 120   ;;  %s1932_s19 = smov 80   ;;  %vm838_vm4 = vcmask 130112   ;;  %vm1011_vm5 = vcmask 195712   ;;  %vm1184_vm6 = vcmask 261312  }
  0xa3   : > { %1572 = vmatpush3.bf16.msra.mxu0 %v1571_v5  ;;  %s1933_s9 = smov 72   ;;  %s1934_s20 = smov 112  }
  0xa4   : > { %1573 = vmatprep.subr.bf16.mxu0 %v1925_v0  ;;  %s1935_s16 = smov 104   ;;  %s1936_s27 = smov 56  }
  0xa5   : > { %s1937_s12 = smov 48   ;;  %s1938_s24 = smov 40  }
  0xa6   : > { %s1939_s17 = smov 8   ;;  %s1940_s15 = smov 16  }
  0xa7   : > { %1575 = vmatpush3.bf16.msra.mxu0 %v1574_v7  ;;  %s1941_s14 = smov 24   ;;  %p2402_p6 = scmp.ne.s32.totalorder %s2393_s18, 0 }
  0xa8   : > { %1539 = vmatprep.subr.mxu0 %v1927_v1 }
  0xaa   : > { %1517 = vmatmul.mubr.msk.f32.vlgmr.msra.gmra.mrb[0].mxu0 %vm420_vm1, %v408_v8 }
  0xab   : > { %1541 = vmatprep.mubr.msk.f32.mxu0 %vm1926_vm0, %v1927_v1 }
 0x17d   : > { %v490_v10 = vpop.f32.mrb[0].mxu0 }
 0x17e   : > { %v491_v11 = vadd.f32 %v1460_v9, %v490_v10  ;;  %v1518_v12 = vpop.f32.mrb[1].mxu0  ;;  %v1187_v9 = vld [vmem:[#allocation10] sm:$0xff]  ;;  %v1188_v10 = vld [vmem:[#allocation10 + $0x8] sm:$0xff] }
 0x17f   : > { %v1189_v12 = vld [vmem:[#allocation10 + $0x10] sm:$0xff] }
 0x180   : > { %495 = vst.msk [vmem:[#allocation2] sm:$0xff] %vm494_vm2, %v491_v11  ;;  %v1577_v11 = vpack.c.bf16 %v1188_v10, %v1187_v9 }
 0x187   : > { %v2237_v13 = vld [vmem:[#allocation2] sm:$0xff] }
 0x188   : > { %590 = vrot.lane.b32.xlu1 %v2237_v13, %s1928_s21  ;;  %501 = vrot.lane.b32.xlu0 %v2237_v13, %s1929_s23 }
 0x18c   : > { %671 = vrot.lane.b32.xlu1 %v2237_v13, %s1930_s25 }
 0x190   : > { %668 = vrot.lane.b32.xlu1 %v2237_v13, %s1931_s4  ;;  %s1479_s4 = sshll.u32 %s1909_s30, 7  ;;  %s1942_s30 = smov [#allocation12]  }
 0x194   : > { %844 = vrot.lane.b32.xlu1 %v2237_v13, %s1932_s19  ;;  %s403_s19 = scalar_lea.vmem [#allocation12], %s2201_s22  ;;  %s1827_s22 = sshll.u32 %s1942_s30, 4  ;;  %s1828_s22 = int_to_ptr.vmem [resolvable:$false] %s1827_s22 }
 0x1fa   : > { %v591_v14 = vpop.permute.xlu1 %590  ;;  %v502_v15 = vpop.permute.xlu0 %501 }
 0x1fb   : > { %1520 = vmatpush3.xpose.msk.msra.mxu1 %vm503_vm3, %v502_v15 }
 0x1fc   : > { %1524 = vmatprep.subr.mxu1 %v1927_v1 }
 0x1fe   : > { %v672_v16 = vpop.permute.xlu1 %671  ;;  %1522 = vmatmul.mubr.msk.f32.vlgmr.msra.gmra.mrb[0].mxu1 %vm503_vm3, %v2237_v13 }
 0x1ff   : > { %1525 = vmatpush3.msra.mxu1 %v591_v14  ;;  %1526 = vmatprep.mubr.msk.f32.mxu1 %vm1926_vm0, %v1927_v1 }
 0x200   : > { %1529 = vmatprep.subr.mxu1 %v1927_v1 }
 0x202   : > { %v669_v17 = vpop.permute.xlu1 %668 }
 0x206   : > { %v845_v18 = vpop.permute.xlu1 %844 }
 0x207   : > { %1540 = vmatpush3.xpose.msk.msra.mxu0 %vm503_vm3, %v845_v18 }
 0x208   : > { %1549 = vmatprep.subr.mxu0 %v1927_v1 }
 0x2d1   : > { %v575_v19 = vpop.f32.mrb[0].mxu1 }
 0x2d2   : > { %v1523_v20 = vpop.f32.mrb[1].mxu1  ;;  %v579_v21 = vsel %vm503_vm3, %v575_v19, -inf }
 0x2d3   : > { %580 = vmax.xlane.f32.xlu0 %v579_v21 }
 0x2e9   : > { %1017 = vrot.lane.b32.xlu0 %v2237_v13, %s1933_s9  ;;  %s1320_s9 = sshll.u32 %s403_s19, 4  ;;  %s2315_s9 = int_to_ptr.vmem [resolvable:$true] %s1320_s9 }
 0x2ea   : > { %p1830_p4 = scmp.lt.s32.totalorder %s2315_s9, %s1828_s22 }
 0x360   : > { %v581_v22 = vpop.xlane.xlu0 %580 }
 0x361   : > { %v582_v23 = vsub.f32 %v575_v19, %v581_v22 }
 0x363   : > { %v583_v24 = vmul.f32 1.442695, %v582_v23  ;;  %v1474_v23 = vld [vmem:[%s2368_s5] ss:$0 sm:$0xff] }
 0x364   : > { %v1018_v29 = vpop.permute.xlu0 %1017 }
 0x365   : > { %1689 = vpow2.f32 %v583_v24 }
 0x36f   : > { %v1690_v25 = vpop.eup %1689 }
 0x370   : > { %v585_v26 = vsel %vm503_vm3, %v1690_v25, 0.0 }
 0x371   : > { %586 = vadd.xlane.f32.xlu1 %v585_v26 }
 0x382   : > { %841 = vrot.lane.b32.xlu1 %v2237_v13, %s1934_s20 }
 0x386   : > { %1014 = vrot.lane.b32.xlu1 %v2237_v13, %s1935_s16 }
 0x3fe   : > { %v587_v27 = vpop.xlane.xlu1 %586 }
 0x3ff   : > { %1691 = vrcp.f32 %v587_v27 }
 0x402   : > { %v842_v28 = vpop.permute.xlu1 %841 }
 0x403   : > { %1542 = vmatmul.mubr.msk.f32.vlgmr.msra.gmra.mrb[2].mxu0 %vm503_vm3, %v842_v28 }
 0x404   : > { %1550 = vmatpush3.xpose.msk.msra.mxu0 %vm503_vm3, %v1018_v29  ;;  %1551 = vmatprep.mubr.msk.f32.mxu0 %vm1926_vm0, %v1927_v1 }
 0x405   : > { %1576 = vmatprep.subr.bf16.mxu0 %v1925_v0 }
 0x406   : > { %v1015_v30 = vpop.permute.xlu1 %1014 }
 0x407   : > { %1552 = vmatmul.mubr.msk.f32.vlgmr.msra.gmra.mrb[4].mxu0 %vm503_vm3, %v1015_v30 }
 0x408   : > { %1567 = vmatprep.mubr.msk.f32.mxu0 %vm1926_vm0, %v1927_v1  ;;  %1578 = vmatpush3.bf16.msra.mxu0 %v1577_v11 }
 0x409   : > { %v1692_v31 = vpop.eup %1691  ;;  %1579 = vmatprep.subr.bf16.mxu0 %v1925_v0 }
 0x40a   : > { %v589_v32 = vmul.f32 %v1692_v31, %v1690_v25  ;;  %v1272_v25 = vld [vmem:[%s358_s26] sm:$0xff] }
 0x40c   : > { %1527 = vmatmul.mubr.msk.f32.vlgmr.msra.gmra.mrb[2].mxu1 %vm503_vm3, %v589_v32 }
 0x40d   : > { %1530 = vmatpush3.xpose.msk.msra.mxu1 %vm503_vm3, %v672_v16  ;;  %1531 = vmatprep.mubr.msk.f32.mxu1 %vm1926_vm0, %v1927_v1 }
 0x40e   : > { %1534 = vmatprep.subr.mxu1 %v1927_v1 }
 0x410   : > { %1532 = vmatmul.mubr.msk.f32.vlgmr.msra.gmra.mrb[4].mxu1 %vm503_vm3, %v669_v17 }
 0x411   : > { %1536 = vmatprep.mubr.msk.f32.mxu1 %vm1926_vm0, %v1927_v1 }
 0x4d6   : > { %v916_v33 = vpop.f32.mrb[2].mxu0 }
 0x4d7   : > { %v1543_v34 = vpop.f32.mrb[3].mxu0  ;;  %v920_v35 = vsel %vm503_vm3, %v916_v33, -inf }
 0x4d8   : > { %921 = vmax.xlane.f32.xlu0 %v920_v35 }
 0x4da   : > { %v1089_v36 = vpop.f32.mrb[4].mxu0 }
 0x4db   : > { %v1553_v37 = vpop.f32.mrb[5].mxu0  ;;  %v1093_v43 = vsel %vm503_vm3, %v1089_v36, -inf }
 0x4df   : > { %v662_v38 = vpop.f32.mrb[2].mxu1 }
 0x4e0   : > { %666 = vst.msk [vmem:[#allocation3] sm:$0xff] %vm503_vm3, %v662_v38  ;;  %v1528_v39 = vpop.f32.mrb[3].mxu1 }
 0x4e1   : > { %v1476_v39 = vld [vmem:[%s2369_s6] ss:$0 sm:$0xff] }
 0x4e3   : > { %v743_v40 = vpop.f32.mrb[4].mxu1 }
 0x4e4   : > { %v1533_v41 = vpop.f32.mrb[5].mxu1  ;;  %v747_v42 = vsel %vm503_vm3, %v743_v40, -inf }
 0x4e5   : > { %748 = vmax.xlane.f32.xlu1 %v747_v42  ;;  %v1477_v41 = vld [vmem:[%s2370_s7] ss:$0 sm:$0xff] }
 0x4e9   : > { %1094 = vmax.xlane.f32.xlu1 %v1093_v43 }
 0x565   : > { %v922_v44 = vpop.xlane.xlu0 %921 }
 0x566   : > { %v923_v45 = vsub.f32 %v916_v33, %v922_v44 }
 0x568   : > { %v924_v46 = vmul.f32 1.442695, %v923_v45 }
 0x56a   : > { %1693 = vpow2.f32 %v924_v46 }
 0x572   : > { %v749_v47 = vpop.xlane.xlu1 %748 }
 0x573   : > { %v750_v55 = vsub.f32 %v743_v40, %v749_v47 }
 0x574   : > { %v1694_v48 = vpop.eup %1693 }
 0x575   : > { %v926_v49 = vsel %vm503_vm3, %v1694_v48, 0.0  ;;  %v751_v56 = vmul.f32 1.442695, %v750_v55 }
 0x576   : > { %927 = vadd.xlane.f32.xlu1 %v926_v49  ;;  %v1095_v50 = vpop.xlane.xlu1 %1094 }
 0x577   : > { %v1096_v51 = vsub.f32 %v1089_v36, %v1095_v50 }
 0x579   : > { %v1097_v52 = vmul.f32 1.442695, %v1096_v51 }
 0x57b   : > { %1695 = vpow2.f32 %v1097_v52 }
 0x57c   : > { %1697 = vpow2.f32 %v751_v56 }
 0x585   : > { %v1696_v53 = vpop.eup %1695 }
 0x586   : > { %v1099_v54 = vsel %vm503_vm3, %v1696_v53, 0.0  ;;  %v1698_v57 = vpop.eup %1697 }
 0x587   : > { %758 = vrot.lane.b32.xlu1 %v2237_v13, %s1936_s27  ;;  %1100 = vadd.xlane.f32.xlu0 %v1099_v54  ;;  %v753_v58 = vsel %vm503_vm3, %v1698_v57, 0.0  ;;  %s2313_s27 = scalar_lea.hbm %s2371_s8, %s1479_s4 }
 0x59d   : > { %931 = vrot.lane.b32.xlu0 %v2237_v13, %s1937_s12  ;;  %s1306_s12 = scalar_lea.sflag [#allocation6], %s2198_s2 }
 0x5ab   : > { %754 = vadd.xlane.f32.xlu1 %v753_v58 }
 0x5bc   : > { %1104 = vrot.lane.b32.xlu1 %v2237_v13, %s1938_s24  ;;  %v1190_v13 = vld [vmem:[#allocation10 + $0x18] sm:$0xff]  ;;  %s1823_s24 = scalar_lea.vmem %s2315_s9, 128 }
 0x5bd   : > { %v1580_v14 = vpack.c.bf16 %v1190_v13, %v1189_v12  ;;  %p1824_p1 = scmp.ne.s32.totalorder %s2315_s9, %s1823_s24 }
 0x5bf   : > { %1581 = vmatpush3.bf16.msra.mxu0 %v1580_v14  ;;  %p1825_p10 = pnand %p1824_p1, %p2402_p6 }
 0x5c1   : > { %p1826_p3 = pneg %p1825_p10 }
 0x603   : > { %v928_v59 = vpop.xlane.xlu1 %927 }
 0x607   : > { %v759_v60 = vpop.permute.xlu1 %758 }
 0x608   : > { %1535 = vmatpush3.msra.mxu1 %v759_v60 }
 0x609   : > { %1544 = vmatprep.subr.mxu1 %v1927_v1 }
 0x614   : > { %v1101_v62 = vpop.xlane.xlu0 %1100 }
 0x618   : > { %v932_v4 = vpop.permute.xlu0 %931 }
 0x638   : > { %v755_v61 = vpop.xlane.xlu1 %754 }
 0x639   : > { %1699 = vrcp.f32 %v755_v61 }
 0x63a   : > { %1701 = vrcp.f32 %v928_v59 }
 0x63b   : > { %1703 = vrcp.f32 %v1101_v62 }
 0x63c   : > { %v1105_v7 = vpop.permute.xlu1 %1104 }
 0x643   : > { %v1700_v63 = vpop.eup %1699 }
 0x644   : > { %v757_v2 = vmul.f32 %v1700_v63, %v1698_v57  ;;  %v1702_v3 = vpop.eup %1701 }
 0x645   : > { %v930_v5 = vmul.f32 %v1702_v3, %v1694_v48  ;;  %v1704_v6 = vpop.eup %1703 }
 0x646   : > { %1537 = vmatmul.mubr.msk.f32.vlgmr.msra.gmra.mrb[6].mxu1 %vm503_vm3, %v757_v2  ;;  %v1103_v8 = vmul.f32 %v1704_v6, %v1696_v53 }
 0x647   : > { %1545 = vmatpush3.msra.mxu1 %v932_v4  ;;  %1546 = vmatprep.mubr.msk.f32.mxu1 %vm1926_vm0, %v1927_v1 }
 0x648   : > { %1554 = vmatprep.subr.mxu1 %v1927_v1 }
 0x64a   : > { %1547 = vmatmul.mubr.msk.f32.vlgmr.msra.gmra.mrb[8].mxu1 %vm503_vm3, %v930_v5 }
 0x64b   : > { %1555 = vmatpush3.msra.mxu1 %v1105_v7  ;;  %1556 = vmatprep.mubr.msk.f32.mxu1 %vm1926_vm0, %v1927_v1 }
 0x64e   : > { %1557 = vmatmul.mubr.msk.f32.vlgmr.msra.gmra.mrb[10].mxu1 %vm503_vm3, %v1103_v8 }
 0x719   : > { %v830_v15 = vpop.f32.mrb[6].mxu1 }
 0x71a   : > { %835 = vrot.lane.b32.xlu1 %v830_v15, %s1939_s17  ;;  %v1538_v16 = vpop.f32.mrb[7].mxu1  ;;  %s1829_s17 = scalar_lea.vmem %s1828_s22, 256 }
 0x71b   : > { %p1831_p9 = scmp.lt.s32.totalorder %s1829_s17, %s1823_s24 }
 0x71d   : > { %v1003_v17 = vpop.f32.mrb[8].mxu1  ;;  %p1832_p5 = por %p1831_p9, %p1830_p4 }
 0x71e   : > { %1008 = vrot.lane.b32.xlu0 %v1003_v17, %s1940_s15  ;;  %v1548_v1 = vpop.f32.mrb[9].mxu1 }
 0x71f   : > { %p1833_p7 = pnand %p1832_p5, %p1826_p3 }
 0x721   : > { %v1176_v18 = vpop.f32.mrb[10].mxu1 }
 0x722   : > { %1181 = vrot.lane.b32.xlu1 %v1176_v18, %s1941_s14  ;;  %v1558_v19 = vpop.f32.mrb[11].mxu1 }
 0x78c   : > { %v836_v20 = vpop.permute.xlu1 %835 }
 0x78d   : > { %839 = vst.msk [vmem:[#allocation3] sm:$0xff] %vm838_vm4, %v836_v20 }
 0x790   : > { %v1009_v21 = vpop.permute.xlu0 %1008 }
 0x791   : > { %1012 = vst.msk [vmem:[#allocation3] sm:$0xff] %vm1011_vm5, %v1009_v21 }
 0x794   : > { %v1182_v0 = vpop.permute.xlu1 %1181 }
 0x795   : > { %1185 = vst.msk [vmem:[#allocation3] sm:$0xff] %vm1184_vm6, %v1182_v0 }
 0x79c   : > { %v1186_v22 = vld [vmem:[#allocation3] sm:$0xff] }
 0x79d   : > { %1568 = vmatmul.mubr.msk.f32.vlgmr.msra.gmra.mrb[6].mxu0 %vm420_vm1, %v1186_v22 }
 0x870   : > { %v1268_v24 = vpop.f32.mrb[6].mxu0 }
 0x871   : > { %v1269_v26 = vadd.f32 %v1474_v23, %v1268_v24  ;;  %v1569_v27 = vpop.f32.mrb[7].mxu0 }
 0x873   : > { %v1273_v28 = vadd.f32 %v1272_v25, %v1269_v26 }
 0x875   : > { %v1274_v29 = vsel %vm420_vm1, %v1273_v28, 0.0 }
 0x876   : > { %1275 = vadd.xlane.f32.xlu0 %v1274_v29 }
 0x903   : > { %v1276_v30 = vpop.xlane.xlu0 %1275 }
 0x904   : > { %v1278_v31 = vmul.f32 0.03125, %v1276_v30 }
 0x906   : > { %v1279_v32 = vsub.f32 %v1273_v28, %v1278_v31 }
 0x908   : > { %v1280_v33 = vmul.f32 %v1279_v32, %v1279_v32 }
 0x90a   : > { %v1281_v34 = vsel %vm420_vm1, %v1280_v33, 0.0 }
 0x90b   : > { %1282 = vadd.xlane.f32.xlu1 %v1281_v34 }
 0x998   : > { %v1283_v35 = vpop.xlane.xlu1 %1282 }
 0x999   : > { %v1284_v36 = vmul.f32 0.03125, %v1283_v35 }
 0x99b   : > { %v1285_v37 = vadd.f32 1e-12, %v1284_v36 }
 0x99d   : > { %1705 = vrsqrt.f32 %v1285_v37 }
 0x9a7   : > { %v1706_v38 = vpop.eup %1705 }
 0x9a8   : > { %v1287_v40 = vmul.f32 %v1706_v38, %v1279_v32 }
 0x9aa   : > { %v1295_v42 = vmul.f32 %v1476_v39, %v1287_v40 }
 0x9ac   : > { %v1303_v43 = vadd.f32 %v1477_v41, %v1295_v42 }
 0x9ae   : > { %1304 = vst.msk [vmem:[%s403_s19] sm:$0xff] %vm420_vm1, %v1303_v43 }
 0x9af   : > { %1836 = shalt.err (!%p1833_p7)
}
 0x9b0   : > { %s1837_s2 = scalar_lea.hbm %s2313_s27, 128  ;;  %s1841_s11 = scalar_lea.hbm %s2371_s8, 256 }
 0x9b1   : > { %p1838_p13 = scmp.ne.s32.totalorder %s2313_s27, %s1837_s2  ;;  %p1842_p2 = scmp.lt.u32.totalorder %s2313_s27, %s2371_s8 }
 0x9b2   : > { %p1843_p12 = scmp.lt.u32.totalorder %s1841_s11, %s1837_s2  ;;  %p1845_p1 = scmp.lt.u32.totalorder %s1837_s2, %s2313_s27 }
 0x9b3   : > { %p1839_p8 = pnand %p1838_p13, %p2402_p6 }
 0x9b4   : > { %p1844_p0 = por %p1843_p12, %p1842_p2 }
 0x9b5   : > { %p1840_p11 = pneg %p1839_p8 }
 0x9b6   : > { %p1846_p10 = por %p1845_p1, %p1844_p0 }
 0x9b8   : > { %p1847_p3 = pnand %p1846_p10, %p1840_p11 }
 0x9ba   : > { %1850 = shalt.err (!%p1847_p3)
}
 0x9bb   : > { %1594 = dma.vmem_to_hbm [thread:$0]  (%p2402_p6), %s2315_s9, 128, %s2313_s27, %s1306_s12  }
 0x9bc PF: > { %s2403_s21 = sld [smem:[#allocation18_spill]]  ;;  %s2404_s23 = sld [smem:[#allocation20_spill]] }
 0x9bd   : > { %p2406_p9 = scmp.ge.s32.totalorder %s1917_s10, 2 }
 0x9c2   : > { %s1332_s25 = sand.u32 1, %s2403_s21   ;;  %p2405_p4 = scmp.ne.s32.totalorder %s2404_s23, 0 }
 0x9c3   : > { %s1333_s4 = scalar_lea.sflag [#allocation6], %s1332_s25 }
 0x9c4   : > { %p1611_p5 = pnand %p2406_p9, %p2405_p4 }
 0x9c6   : > { %1892 = dma.done.wait (!%p1611_p5), %s1333_s4, 128  }
 0x9c7   : > { %1894 = vsyncadd (!%p1611_p5), %s1333_s4, 4294967168  ;;  %s28_s10 = sadd.s32 1, %s1917_s10   ;;  %s2407_s18 = sld [smem:[#allocation22_spill]] }
 0x9c8   : > { %p25_p7 = scmp.ge.s32.totalorder %s28_s10, 4   ;;  %s2408_s30 = sld [smem:[#allocation19_spill]] }
 0x9c9   : > { %s2409_s9 = sld [smem:[#allocation21_spill]]  ;;  %s2410_s27 = smov %s1901_s28 }
 0x9ca   : > { %s2411_s28 = smov %s1905_s29  ;;  %27 = sbr.rel (!%p25_p7) target bundleno = 12 (0xc), region = 123 }
 0x9cd   : > { %s2412_s29 = smov %s2407_s18 }
 0x9d1   :  { %1338 = vsyncpa [#allocation5], 1 }
 0x9d2   :  { %1340 = vsyncpa [#allocation5 + $0x1], 1 }
 0x9d3   :  { %1341 = vsyncpa [#allocation8], 1 }
 0x9d4   :  { %1343 = vsyncpa [#allocation8 + $0x1], 1 }
 0x9d5   :  { %1344 = vsyncpa [#allocation11], 1 }
 0x9d6   :  { %1345 = vsyncpa [#allocation6], 1 }
 0x9d7   :  { %1347 = vsyncpa [#allocation6 + $0x1], 1 }

// kernel: tpu_custom_call.1
= control target key start
LH: loop header
LB: loop body
LE: loop exit
PB: predicated region body
PF: predicated region fallthrough
CT: control target
= control target key end

     0   :  { %s2363_s0 = inlined_call_operand.hbm [shape: f32[2,8,32], index: 0, kind: input, shape index: {}]   ;;  %s2364_s1 = inlined_call_operand.hbm [shape: f32[2,8,32], index: 1, kind: input, shape index: {}]   ;;  %s2365_s2 = inlined_call_operand.hbm [shape: f32[32,96], index: 2, kind: input, shape index: {}]   ;;  %s2366_s3 = inlined_call_operand.vmem [shape: f32[1,96], index: 3, kind: input, shape index: {}]   ;;  %s2367_s4 = inlined_call_operand.hbm [shape: f32[32,32], index: 4, kind: input, shape index: {}]   ;;  %s2368_s5 = inlined_call_operand.vmem [shape: f32[1,32], index: 5, kind: input, shape index: {}]   ;;  %s2369_s6 = inlined_call_operand.vmem [shape: f32[1,32], index: 6, kind: input, shape index: {}]   ;;  %s2370_s7 = inlined_call_operand.vmem [shape: f32[1,32], index: 7, kind: input, shape index: {}]   ;;  %s2371_s8 = inlined_call_operand.hbm [shape: f32[2,8,32], index: 8, kind: output, shape index: {}]  }
   0x1   :  { %2380 = sst [smem:[#allocation23_spill]] %s2365_s2 }
   0x2   :  { %2381 = sst [smem:[#allocation24_spill]] %s2367_s4 }
   0x3   :  { %13 = vsyncpa [#allocation5], 0 }
   0x4   :  { %15 = vsyncpa [#allocation5 + $0x1], 0 }
   0x5   :  { %16 = vsyncpa [#allocation8], 0 }
   0x6   :  { %18 = vsyncpa [#allocation8 + $0x1], 0 }
   0x7   :  { %19 = vsyncpa [#allocation11], 0 }
   0x8   :  { %20 = vsyncpa [#allocation6], 0 }
   0x9   :  { %22 = vsyncpa [#allocation6 + $0x1], 0  ;;  %s1988_s27 = smov 0   ;;  %s1990_s28 = smov 0  }
   0xa   :  { %s1992_s29 = smov 0   ;;  %s1994_s30 = smov 0  }
   0xb   :  { %s1996_s9 = smov 0   ;;  %s1998_s10 = smov 0  }
   0xc LB: > { %2382 = sst [smem:[#allocation18_spill]] %s1897_s27  ;;  %s2019_s11 = sadd.s32 4294967295, %s1917_s10   ;;  %s1917_s10 = sphi %s1998_s10, %s28_s10   ;;  %s1913_s9 = sphi %s1996_s9, %s2409_s9   ;;  %s1909_s30 = sphi %s1994_s30, %s2408_s30   ;;  %s1905_s29 = sphi %s1992_s29, %s2412_s29   ;;  %s1901_s28 = sphi %s1990_s28, %s2411_s28   ;;  %s1897_s27 = sphi %s1988_s27, %s2410_s27  }
   0xd   : > { %2383 = sst [smem:[#allocation19_spill]] %s1913_s9  ;;  %s1445_s12 = sadd.s32 4294967294, %s1917_s10  }
   0xe   : > { %p60_p0 = scmp.ne.s32.totalorder %s1901_s28, %s1897_s27  ;;  %p2372_p1 = scmp.eq.s32.totalorder %s2019_s11, 0 }
   0xf   : > { %p246_p3 = scmp.eq.s32.totalorder %s1445_s12, 1  ;;  %p1446_p5 = scmp.ge.s32.totalorder %s1917_s10, 1 }
  0x10   : > { %p2028_p4 = por %p2372_p1, %p60_p0  ;;  %p253_p7 = scmp.lt.s32.totalorder %s1917_s10, 3 }
  0x11   : > { %p2033_p6 = por %p246_p3, %p60_p0  ;;  %s1919_s16 = smov [#allocation9]  }
  0x12   : > { %s2384_s13 = scalar_select %p2028_p4, 1, 0 }
  0x13   : > { %s2385_s14 = scalar_select %p2033_p6, 1, 0 }
  0x14   : > { %p2038_p8 = pnand %p1446_p5, %p253_p7  ;;  %s265_s17 = sshll.u32 %s1919_s16, 4  ;;  %s2042_s17 = int_to_ptr.vmem [resolvable:$true] %s265_s17 }
  0x15   : > { %2386 = sst [smem:[#allocation20_spill]] %s2385_s14  ;;  %s1920_s19 = smov [#allocation10]  }
  0x16   : > { %s2387_s15 = scalar_select %p2038_p8, 1, 0 }
  0x17   : > { %p1596_p9 = pneg %p2038_p8  ;;  %s281_s20 = sshll.u32 %s1920_s19, 4  ;;  %s2053_s20 = int_to_ptr.vmem [resolvable:$true] %s281_s20 }
  0x18   : > { %s2389_s2 = sld [smem:[#allocation23_spill]] }
  0x19   : > { %p2049_p11 = pnand %p1596_p9, %p2372_p1 }
  0x1b   : > { %p1709_p13 = pneg %p2049_p11 }
  0x1e   : > { %s1707_s23 = scalar_lea.hbm %s2389_s2, 512 }
  0x1f   : > { %p1708_p12 = scmp.ne.s32.totalorder %s2389_s2, %s1707_s23  ;;  %p1714_p5 = scmp.lt.u32.totalorder %s1707_s23, %s2389_s2 }
  0x21   : > { %p1710_p0 = pnand %p1709_p13, %p1708_p12 }
  0x23   : > { %p1711_p3 = pneg %p1710_p0 }
  0x25   : > { %p1716_p7 = pnand %p1714_p5, %p1711_p3 }
  0x27   : > { %1719 = shalt.err (!%p1716_p7)
}
  0x28   : > { %s1720_s16 = scalar_lea.vmem %s2042_s17, 512  ;;  %p1728_p2 = scmp.lt.s32.totalorder %s2042_s17, %s2042_s17 }
  0x29   : > { %p1721_p9 = scmp.ne.s32.totalorder %s2042_s17, %s1720_s16  ;;  %p1729_p12 = scmp.lt.s32.totalorder %s1720_s16, %s1720_s16 }
  0x2b   : > { %p1723_p10 = pnand %p1721_p9, %p1709_p13  ;;  %p1730_p0 = por %p1729_p12, %p1728_p2 }
  0x2d   : > { %p1724_p1 = pneg %p1723_p10 }
  0x2f   : > { %p1731_p6 = pnand %p1730_p0, %p1724_p1 }
  0x31   : > { %1734 = shalt.err (!%p1731_p6)
}
  0x32   : > { %s1921_s19 = smov 128   ;;  %s1922_s21 = smov 8  }
  0x33   : > { %1599 = dma.hbm_to_vmem [thread:$0]  (!%p2049_p11), %s2389_s2, 512, %s2042_s17, [#allocation8], %s1921_s19, %s1921_s19, %s1922_s21  }
  0x34   : > { %s2390_s4 = sld [smem:[#allocation24_spill]] }
  0x3a   : > { %s1735_s26 = scalar_lea.hbm %s2390_s4, 512 }
  0x3b   : > { %p1736_p2 = scmp.ne.s32.totalorder %s2390_s4, %s1735_s26  ;;  %p1742_p10 = scmp.lt.u32.totalorder %s1735_s26, %s2390_s4 }
  0x3d   : > { %p1738_p1 = pnand %p1736_p2, %p1709_p13 }
  0x3f   : > { %p1739_p6 = pneg %p1738_p1 }
  0x41   : > { %p1744_p3 = pnand %p1742_p10, %p1739_p6 }
  0x43   : > { %1747 = shalt.err (!%p1744_p3)
}
  0x44   : > { %s1748_s17 = scalar_lea.vmem %s2053_s20, 512  ;;  %p1756_p12 = scmp.lt.s32.totalorder %s2053_s20, %s2053_s20 }
  0x45   : > { %p1749_p5 = scmp.ne.s32.totalorder %s2053_s20, %s1748_s17  ;;  %p1757_p0 = scmp.lt.s32.totalorder %s1748_s17, %s1748_s17 }
  0x47   : > { %p1751_p7 = pnand %p1749_p5, %p1709_p13  ;;  %p1758_p2 = por %p1757_p0, %p1756_p12 }
  0x49   : > { %p1752_p9 = pneg %p1751_p7 }
  0x4b   : > { %p1759_p1 = pnand %p1758_p2, %p1752_p9 }
  0x4d   : > { %1762 = shalt.err (!%p1759_p1)
}
  0x4e   : > { %1602 = dma.hbm_to_vmem [thread:$0]  (!%p2049_p11), %s2390_s4, 512, %s2053_s20, [#allocation11], %s1921_s19, %s1921_s19, %s1922_s21  }
  0x4f   : > { %s40_s22 = sadd.s32 1, %s1913_s9  ;;  %s47_s23 = sadd.s32 1, %s1905_s29 }
  0x50   : > { %p42_p13 = scmp.ge.s32.totalorder %s40_s22, 2  ;;  %p54_p6 = scmp.ne.s32.totalorder %s1905_s29, %s1901_s28 }
  0x51   : > { %p55_p10 = scmp.eq.s32.totalorder %s1917_s10, 0  ;;  %p1616_p3 = scmp.lt.s32.totalorder %s1917_s10, 2 }
  0x52   : > { %s2414_s22 = smov (%p42_p13, %s40_s22), 0  ;;  %p2392_p7 = scmp.eq.s32.totalorder %s2019_s11, 1 }
  0x53   : > { %2391 = sst [smem:[#allocation21_spill]] %s2414_s22  ;;  %p56_p5 = por %p55_p10, %p54_p6 }
  0x54   : > { %p2117_p9 = por %p2392_p7, %p54_p6  ;;  %s44_s24 = ssub.s32 %s1913_s9, %s2414_s22 }
  0x55   : > { %s304_s25 = sand.u32 1, %s1905_s29   ;;  %p45_p12 = scmp.eq.s32.totalorder %s44_s24, 0 }
  0x56   : > { %s2393_s18 = scalar_select %p2117_p9, 1, 0 }
  0x57   : > { %s2124_s20 = sshll.u32 %s304_s25, 3  ;;  %s1451_s19 = sshll.u32 %s1913_s9, 7 }
  0x58   : > { %s2128_s21 = scalar_select %p45_p12, %s1905_s29, %s47_s23  }
  0x59   : > { %s2133_s16 = scalar_lea.hbm %s2363_s0, %s1451_s19  ;;  %s308_s17 = scalar_lea.vmem [#allocation4], %s2124_s20 }
  0x5a   : > { %2394 = sst [smem:[#allocation22_spill]] %s2128_s21  ;;  %s315_s27 = sshll.u32 %s308_s17, 4  ;;  %s2142_s27 = int_to_ptr.vmem [resolvable:$true] %s315_s27 }
  0x5b   : > { %p2138_p11 = pnand %p1616_p3, %p56_p5  ;;  %s2147_s26 = scalar_lea.hbm %s2364_s1, %s1451_s19 }
  0x5c   : > { %s305_s12 = scalar_lea.sflag [#allocation5], %s304_s25  ;;  %s1763_s2 = scalar_lea.hbm %s2133_s16, 128 }
  0x5d   : > { %p1764_p0 = scmp.ne.s32.totalorder %s2133_s16, %s1763_s2  ;;  %p1765_p2 = pneg %p2138_p11 }
  0x5e   : > { %s1768_s22 = scalar_lea.hbm %s2363_s0, 256  ;;  %p1769_p6 = scmp.lt.u32.totalorder %s2133_s16, %s2363_s0 }
  0x5f   : > { %p1766_p1 = pnand %p1765_p2, %p1764_p0  ;;  %p1770_p10 = scmp.lt.u32.totalorder %s1768_s22, %s1763_s2 }
  0x60   : > { %p1772_p5 = scmp.lt.u32.totalorder %s1763_s2, %s2133_s16 }
  0x61   : > { %p1767_p13 = pneg %p1766_p1  ;;  %p1771_p3 = por %p1770_p10, %p1769_p6 }
  0x63   : > { %p1773_p7 = por %p1772_p5, %p1771_p3 }
  0x65   : > { %p1774_p12 = pnand %p1773_p7, %p1767_p13 }
  0x67   : > { %1777 = shalt.err (!%p1774_p12)
}
  0x68   : > { %s1778_s25 = scalar_lea.vmem %s2142_s27, 128  ;;  %s1923_s4 = smov [#allocation4]  }
  0x69   : > { %p1779_p0 = scmp.ne.s32.totalorder %s2142_s27, %s1778_s25  ;;  %s1783_s19 = sshll.u32 %s1923_s4, 4  ;;  %s1784_s19 = int_to_ptr.vmem [resolvable:$false] %s1783_s19 }
  0x6a   : > { %s1785_s9 = scalar_lea.vmem %s1784_s19, 256  ;;  %p1786_p4 = scmp.lt.s32.totalorder %s2142_s27, %s1784_s19 }
  0x6b   : > { %p1781_p1 = pnand %p1779_p0, %p1765_p2  ;;  %p1787_p6 = scmp.lt.s32.totalorder %s1785_s9, %s1778_s25 }
  0x6d   : > { %p1782_p9 = pneg %p1781_p1  ;;  %p1788_p10 = por %p1787_p6, %p1786_p4 }
  0x6f   : > { %p1789_p3 = pnand %p1788_p10, %p1782_p9 }
  0x71   : > { %1792 = shalt.err (!%p1789_p3)
}
  0x72   : > { %1606 = dma.hbm_to_vmem [thread:$0]  (!%p2138_p11), %s2133_s16, 128, %s2142_s27, %s305_s12  }
  0x73   : > { %s322_s2 = sand.u32 1, %s1917_s10   ;;  %s326_s22 = scalar_lea.vmem [#allocation7], %s2124_s20 }
  0x74   : > { %s334_s21 = sshll.u32 %s326_s22, 4  ;;  %s323_s23 = scalar_lea.sflag [#allocation8], %s322_s2  ;;  %s335_s21 = int_to_ptr.vmem [resolvable:$true] %s334_s21 }
  0x75   : > { %s1793_s24 = scalar_lea.hbm %s2147_s26, 128  ;;  %s1798_s4 = scalar_lea.hbm %s2364_s1, 256 }
  0x76   : > { %p1794_p4 = scmp.ne.s32.totalorder %s2147_s26, %s1793_s24  ;;  %p1799_p5 = scmp.lt.u32.totalorder %s2147_s26, %s2364_s1 }
  0x77   : > { %p1800_p7 = scmp.lt.u32.totalorder %s1798_s4, %s1793_s24  ;;  %p1802_p0 = scmp.lt.u32.totalorder %s1793_s24, %s2147_s26 }
  0x78   : > { %p1796_p9 = pnand %p1794_p4, %p1765_p2 }
  0x79   : > { %p1801_p12 = por %p1800_p7, %p1799_p5 }
  0x7a   : > { %p1797_p13 = pneg %p1796_p9 }
  0x7b   : > { %p1803_p1 = por %p1802_p0, %p1801_p12 }
  0x7d   : > { %p1804_p6 = pnand %p1803_p1, %p1797_p13 }
  0x7f   : > { %1807 = shalt.err (!%p1804_p6)
}
  0x80   : > { %s1808_s20 = scalar_lea.vmem %s335_s21, 128  ;;  %s1924_s16 = smov [#allocation7]  }
  0x81   : > { %p1809_p10 = scmp.ne.s32.totalorder %s335_s21, %s1808_s20  ;;  %s1813_s27 = sshll.u32 %s1924_s16, 4  ;;  %s1814_s27 = int_to_ptr.vmem [resolvable:$false] %s1813_s27 }
  0x82   : > { %s1815_s12 = scalar_lea.vmem %s1814_s27, 256  ;;  %p1816_p9 = scmp.lt.s32.totalorder %s335_s21, %s1814_s27 }
  0x83   : > { %p1811_p3 = pnand %p1809_p10, %p1765_p2  ;;  %p1817_p8 = scmp.lt.s32.totalorder %s1815_s12, %s1808_s20 }
  0x85   : > { %p1812_p4 = pneg %p1811_p3  ;;  %p1818_p5 = por %p1817_p8, %p1816_p9 }
  0x87   : > { %p1819_p7 = pnand %p1818_p5, %p1812_p4 }
  0x89   : > { %1822 = shalt.err (!%p1819_p7)
}
  0x8a   : > { %1609 = dma.hbm_to_vmem [thread:$0]  (!%p2138_p11), %s2147_s26, 128, %s335_s21, %s323_s23  }
  0x8b   : > { %p2396_p13 = scmp.ne.s32.totalorder %s2387_s15, 0 }
  0x8c   : > { %s2198_s2 = sand.u32 (!%p2396_p13), 1, %s1901_s28   ;;  %p2397_p8 = scmp.ne.s32.totalorder (!%p2396_p13), %s2384_s13, 0 }
  0x8d   : > { %343 = sbr.rel (%p2396_p13) target bundleno = 2492 (0x9bc), region = 52  ;;  %s2201_s22 = sshll.u32 (!%p2396_p13), %s2198_s2, 3 }
  0x8e   : > { %s346_s24 = scalar_lea.sflag (!%p2396_p13), [#allocation5], %s2198_s2  ;;  %s349_s17 = scalar_lea.vmem (!%p2396_p13), [#allocation4], %s2201_s22 }
  0x94   : > { %1876 = dma.done.wait (%p2397_p8), %s346_s24, 128  }
  0x95   : > { %1878 = vsyncadd (%p2397_p8), %s346_s24, 4294967168  ;;  %s354_s15 = sand.u32 1, %s2019_s11   ;;  %s358_s26 = scalar_lea.vmem [#allocation7], %s2201_s22 }
  0x96   : > { %s355_s14 = scalar_lea.sflag [#allocation8], %s354_s15 }
  0x97   : > { %1880 = dma.done.wait (%p2397_p8), %s355_s14, 128  }
  0x98   : > { %1882 = vsyncadd (%p2397_p8), %s355_s14, 4294967168  ;;  %p2398_p11 = scmp.eq.s32.totalorder %s2019_s11, 0 }
  0x9a   : > { %1884 = dma.done.wait (%p2398_p11), [#allocation8], 512   ;;  %p2399_p2 = pmov %p2398_p11 }
  0x9c   : > { %1886 = vsyncadd (%p2399_p2), [#allocation8], 4294966784  ;;  %p2400_p12 = pmov %p2399_p2 }
  0x9d   : > { %p2401_p0 = pmov %p2399_p2 }
  0x9e   : > { %1888 = dma.done.wait (%p2400_p12), [#allocation11], 512  }
  0x9f   : > { %1890 = vsyncadd (%p2401_p0), [#allocation11], 4294966784  ;;  %v1925_v0 = vmov 0.0|0.0   ;;  %vm1926_vm0 = vmmov 0   ;;  %v1927_v1 = vmov 0.0   ;;  %v409_v2 = vld [vmem:[#allocation9] sm:$0xff] }
  0xa0   : > { %1570 = vmatprep.subr.bf16.mxu0 %v1925_v0  ;;  %1516 = vmatprep.mubr.msk.f32.mxu0 %vm1926_vm0, %v1927_v1  ;;  %v410_v3 = vld [vmem:[#allocation9 + $0x8] sm:$0xff]  ;;  %v411_v4 = vld [vmem:[#allocation9 + $0x10] sm:$0xff]  ;;  %v412_v6 = vld [vmem:[#allocation9 + $0x18] sm:$0xff]  ;;  %vm420_vm1 = vcmask 261120   ;;  %vm494_vm2 = vcmask 785408   ;;  %s1928_s21 = smov 64  }
  0xa1   : > { %1519 = vmatprep.subr.mxu1 %v1927_v1  ;;  %1521 = vmatprep.mubr.msk.f32.mxu1 %vm1926_vm0, %v1927_v1  ;;  %v1571_v5 = vpack.c.bf16 %v410_v3, %v409_v2  ;;  %v1574_v7 = vpack.c.bf16 %v412_v6, %v411_v4  ;;  %v408_v8 = vld [vmem:[%s349_s17] sm:$0xff]  ;;  %v1460_v9 = vld [vmem:[%s2366_s3] ss:$0 sm:$0xff]  ;;  %s1929_s23 = smov 96   ;;  %s1930_s25 = smov 88   ;;  %vm503_vm3 = vcmask 64512  }
  0xa2   : > { %s1931_s4 = smov 120   ;;  %s1932_s19 = smov 80   ;;  %vm838_vm4 = vcmask 130112   ;;  %vm1011_vm5 = vcmask 195712   ;;  %vm1184_vm6 = vcmask 261312  }
  0xa3   : > { %1572 = vmatpush3.bf16.msra.mxu0 %v1571_v5  ;;  %s1933_s9 = smov 72   ;;  %s1934_s20 = smov 112  }
  0xa4   : > { %1573 = vmatprep.subr.bf16.mxu0 %v1925_v0  ;;  %s1935_s16 = smov 104   ;;  %s1936_s27 = smov 56  }
  0xa5   : > { %s1937_s12 = smov 48   ;;  %s1938_s24 = smov 40  }
  0xa6   : > { %s1939_s17 = smov 8   ;;  %s1940_s15 = smov 16  }
  0xa7   : > { %1575 = vmatpush3.bf16.msra.mxu0 %v1574_v7  ;;  %s1941_s14 = smov 24   ;;  %p2402_p6 = scmp.ne.s32.totalorder %s2393_s18, 0 }
  0xa8   : > { %1539 = vmatprep.subr.mxu0 %v1927_v1 }
  0xaa   : > { %1517 = vmatmul.mubr.msk.f32.vlgmr.msra.gmra.mrb[0].mxu0 %vm420_vm1, %v408_v8 }
  0xab   : > { %1541 = vmatprep.mubr.msk.f32.mxu0 %vm1926_vm0, %v1927_v1 }
 0x17d   : > { %v490_v10 = vpop.f32.mrb[0].mxu0 }
 0x17e   : > { %v491_v11 = vadd.f32 %v1460_v9, %v490_v10  ;;  %v1518_v12 = vpop.f32.mrb[1].mxu0  ;;  %v1187_v9 = vld [vmem:[#allocation10] sm:$0xff]  ;;  %v1188_v10 = vld [vmem:[#allocation10 + $0x8] sm:$0xff] }
 0x17f   : > { %v1189_v12 = vld [vmem:[#allocation10 + $0x10] sm:$0xff] }
 0x180   : > { %495 = vst.msk [vmem:[#allocation2] sm:$0xff] %vm494_vm2, %v491_v11  ;;  %v1577_v11 = vpack.c.bf16 %v1188_v10, %v1187_v9 }
 0x187   : > { %v2237_v13 = vld [vmem:[#allocation2] sm:$0xff] }
 0x188   : > { %590 = vrot.lane.b32.xlu1 %v2237_v13, %s1928_s21  ;;  %501 = vrot.lane.b32.xlu0 %v2237_v13, %s1929_s23 }
 0x18c   : > { %671 = vrot.lane.b32.xlu1 %v2237_v13, %s1930_s25 }
 0x190   : > { %668 = vrot.lane.b32.xlu1 %v2237_v13, %s1931_s4  ;;  %s1479_s4 = sshll.u32 %s1909_s30, 7  ;;  %s1942_s30 = smov [#allocation12]  }
 0x194   : > { %844 = vrot.lane.b32.xlu1 %v2237_v13, %s1932_s19  ;;  %s403_s19 = scalar_lea.vmem [#allocation12], %s2201_s22  ;;  %s1827_s22 = sshll.u32 %s1942_s30, 4  ;;  %s1828_s22 = int_to_ptr.vmem [resolvable:$false] %s1827_s22 }
 0x1fa   : > { %v591_v14 = vpop.permute.xlu1 %590  ;;  %v502_v15 = vpop.permute.xlu0 %501 }
 0x1fb   : > { %1520 = vmatpush3.xpose.msk.msra.mxu1 %vm503_vm3, %v502_v15 }
 0x1fc   : > { %1524 = vmatprep.subr.mxu1 %v1927_v1 }
 0x1fe   : > { %v672_v16 = vpop.permute.xlu1 %671  ;;  %1522 = vmatmul.mubr.msk.f32.vlgmr.msra.gmra.mrb[0].mxu1 %vm503_vm3, %v2237_v13 }
 0x1ff   : > { %1525 = vmatpush3.msra.mxu1 %v591_v14  ;;  %1526 = vmatprep.mubr.msk.f32.mxu1 %vm1926_vm0, %v1927_v1 }
 0x200   : > { %1529 = vmatprep.subr.mxu1 %v1927_v1 }
 0x202   : > { %v669_v17 = vpop.permute.xlu1 %668 }
 0x206   : > { %v845_v18 = vpop.permute.xlu1 %844 }
 0x207   : > { %1540 = vmatpush3.xpose.msk.msra.mxu0 %vm503_vm3, %v845_v18 }
 0x208   : > { %1549 = vmatprep.subr.mxu0 %v1927_v1 }
 0x2d1   : > { %v575_v19 = vpop.f32.mrb[0].mxu1 }
 0x2d2   : > { %v1523_v20 = vpop.f32.mrb[1].mxu1  ;;  %v579_v21 = vsel %vm503_vm3, %v575_v19, -inf }
 0x2d3   : > { %580 = vmax.xlane.f32.xlu0 %v579_v21 }
 0x2e9   : > { %1017 = vrot.lane.b32.xlu0 %v2237_v13, %s1933_s9  ;;  %s1320_s9 = sshll.u32 %s403_s19, 4  ;;  %s2315_s9 = int_to_ptr.vmem [resolvable:$true] %s1320_s9 }
 0x2ea   : > { %p1830_p4 = scmp.lt.s32.totalorder %s2315_s9, %s1828_s22 }
 0x360   : > { %v581_v22 = vpop.xlane.xlu0 %580 }
 0x361   : > { %v582_v23 = vsub.f32 %v575_v19, %v581_v22 }
 0x363   : > { %v583_v24 = vmul.f32 1.442695, %v582_v23  ;;  %v1474_v23 = vld [vmem:[%s2368_s5] ss:$0 sm:$0xff] }
 0x364   : > { %v1018_v29 = vpop.permute.xlu0 %1017 }
 0x365   : > { %1689 = vpow2.f32 %v583_v24 }
 0x36f   : > { %v1690_v25 = vpop.eup %1689 }
 0x370   : > { %v585_v26 = vsel %vm503_vm3, %v1690_v25, 0.0 }
 0x371   : > { %586 = vadd.xlane.f32.xlu1 %v585_v26 }
 0x382   : > { %841 = vrot.lane.b32.xlu1 %v2237_v13, %s1934_s20 }
 0x386   : > { %1014 = vrot.lane.b32.xlu1 %v2237_v13, %s1935_s16 }
 0x3fe   : > { %v587_v27 = vpop.xlane.xlu1 %586 }
 0x3ff   : > { %1691 = vrcp.f32 %v587_v27 }
 0x402   : > { %v842_v28 = vpop.permute.xlu1 %841 }
 0x403   : > { %1542 = vmatmul.mubr.msk.f32.vlgmr.msra.gmra.mrb[2].mxu0 %vm503_vm3, %v842_v28 }
 0x404   : > { %1550 = vmatpush3.xpose.msk.msra.mxu0 %vm503_vm3, %v1018_v29  ;;  %1551 = vmatprep.mubr.msk.f32.mxu0 %vm1926_vm0, %v1927_v1 }
 0x405   : > { %1576 = vmatprep.subr.bf16.mxu0 %v1925_v0 }
 0x406   : > { %v1015_v30 = vpop.permute.xlu1 %1014 }
 0x407   : > { %1552 = vmatmul.mubr.msk.f32.vlgmr.msra.gmra.mrb[4].mxu0 %vm503_vm3, %v1015_v30 }
 0x408   : > { %1567 = vmatprep.mubr.msk.f32.mxu0 %vm1926_vm0, %v1927_v1  ;;  %1578 = vmatpush3.bf16.msra.mxu0 %v1577_v11 }
 0x409   : > { %v1692_v31 = vpop.eup %1691  ;;  %1579 = vmatprep.subr.bf16.mxu0 %v1925_v0 }
 0x40a   : > { %v589_v32 = vmul.f32 %v1692_v31, %v1690_v25  ;;  %v1272_v25 = vld [vmem:[%s358_s26] sm:$0xff] }
 0x40c   : > { %1527 = vmatmul.mubr.msk.f32.vlgmr.msra.gmra.mrb[2].mxu1 %vm503_vm3, %v589_v32 }
 0x40d   : > { %1530 = vmatpush3.xpose.msk.msra.mxu1 %vm503_vm3, %v672_v16  ;;  %1531 = vmatprep.mubr.msk.f32.mxu1 %vm1926_vm0, %v1927_v1 }
 0x40e   : > { %1534 = vmatprep.subr.mxu1 %v1927_v1 }
 0x410   : > { %1532 = vmatmul.mubr.msk.f32.vlgmr.msra.gmra.mrb[4].mxu1 %vm503_vm3, %v669_v17 }
 0x411   : > { %1536 = vmatprep.mubr.msk.f32.mxu1 %vm1926_vm0, %v1927_v1 }
 0x4d6   : > { %v916_v33 = vpop.f32.mrb[2].mxu0 }
 0x4d7   : > { %v1543_v34 = vpop.f32.mrb[3].mxu0  ;;  %v920_v35 = vsel %vm503_vm3, %v916_v33, -inf }
 0x4d8   : > { %921 = vmax.xlane.f32.xlu0 %v920_v35 }
 0x4da   : > { %v1089_v36 = vpop.f32.mrb[4].mxu0 }
 0x4db   : > { %v1553_v37 = vpop.f32.mrb[5].mxu0  ;;  %v1093_v43 = vsel %vm503_vm3, %v1089_v36, -inf }
 0x4df   : > { %v662_v38 = vpop.f32.mrb[2].mxu1 }
 0x4e0   : > { %666 = vst.msk [vmem:[#allocation3] sm:$0xff] %vm503_vm3, %v662_v38  ;;  %v1528_v39 = vpop.f32.mrb[3].mxu1 }
 0x4e1   : > { %v1476_v39 = vld [vmem:[%s2369_s6] ss:$0 sm:$0xff] }
 0x4e3   : > { %v743_v40 = vpop.f32.mrb[4].mxu1 }
 0x4e4   : > { %v1533_v41 = vpop.f32.mrb[5].mxu1  ;;  %v747_v42 = vsel %vm503_vm3, %v743_v40, -inf }
 0x4e5   : > { %748 = vmax.xlane.f32.xlu1 %v747_v42  ;;  %v1477_v41 = vld [vmem:[%s2370_s7] ss:$0 sm:$0xff] }
 0x4e9   : > { %1094 = vmax.xlane.f32.xlu1 %v1093_v43 }
 0x565   : > { %v922_v44 = vpop.xlane.xlu0 %921 }
 0x566   : > { %v923_v45 = vsub.f32 %v916_v33, %v922_v44 }
 0x568   : > { %v924_v46 = vmul.f32 1.442695, %v923_v45 }
 0x56a   : > { %1693 = vpow2.f32 %v924_v46 }
 0x572   : > { %v749_v47 = vpop.xlane.xlu1 %748 }
 0x573   : > { %v750_v55 = vsub.f32 %v743_v40, %v749_v47 }
 0x574   : > { %v1694_v48 = vpop.eup %1693 }
 0x575   : > { %v926_v49 = vsel %vm503_vm3, %v1694_v48, 0.0  ;;  %v751_v56 = vmul.f32 1.442695, %v750_v55 }
 0x576   : > { %927 = vadd.xlane.f32.xlu1 %v926_v49  ;;  %v1095_v50 = vpop.xlane.xlu1 %1094 }
 0x577   : > { %v1096_v51 = vsub.f32 %v1089_v36, %v1095_v50 }
 0x579   : > { %v1097_v52 = vmul.f32 1.442695, %v1096_v51 }
 0x57b   : > { %1695 = vpow2.f32 %v1097_v52 }
 0x57c   : > { %1697 = vpow2.f32 %v751_v56 }
 0x585   : > { %v1696_v53 = vpop.eup %1695 }
 0x586   : > { %v1099_v54 = vsel %vm503_vm3, %v1696_v53, 0.0  ;;  %v1698_v57 = vpop.eup %1697 }
 0x587   : > { %758 = vrot.lane.b32.xlu1 %v2237_v13, %s1936_s27  ;;  %1100 = vadd.xlane.f32.xlu0 %v1099_v54  ;;  %v753_v58 = vsel %vm503_vm3, %v1698_v57, 0.0  ;;  %s2313_s27 = scalar_lea.hbm %s2371_s8, %s1479_s4 }
 0x59d   : > { %931 = vrot.lane.b32.xlu0 %v2237_v13, %s1937_s12  ;;  %s1306_s12 = scalar_lea.sflag [#allocation6], %s2198_s2 }
 0x5ab   : > { %754 = vadd.xlane.f32.xlu1 %v753_v58 }
 0x5bc   : > { %1104 = vrot.lane.b32.xlu1 %v2237_v13, %s1938_s24  ;;  %v1190_v13 = vld [vmem:[#allocation10 + $0x18] sm:$0xff]  ;;  %s1823_s24 = scalar_lea.vmem %s2315_s9, 128 }
 0x5bd   : > { %v1580_v14 = vpack.c.bf16 %v1190_v13, %v1189_v12  ;;  %p1824_p1 = scmp.ne.s32.totalorder %s2315_s9, %s1823_s24 }
 0x5bf   : > { %1581 = vmatpush3.bf16.msra.mxu0 %v1580_v14  ;;  %p1825_p10 = pnand %p1824_p1, %p2402_p6 }
 0x5c1   : > { %p1826_p3 = pneg %p1825_p10 }
 0x603   : > { %v928_v59 = vpop.xlane.xlu1 %927 }
 0x607   : > { %v759_v60 = vpop.permute.xlu1 %758 }
 0x608   : > { %1535 = vmatpush3.msra.mxu1 %v759_v60 }
 0x609   : > { %1544 = vmatprep.subr.mxu1 %v1927_v1 }
 0x614   : > { %v1101_v62 = vpop.xlane.xlu0 %1100 }
 0x618   : > { %v932_v4 = vpop.permute.xlu0 %931 }
 0x638   : > { %v755_v61 = vpop.xlane.xlu1 %754 }
 0x639   : > { %1699 = vrcp.f32 %v755_v61 }
 0x63a   : > { %1701 = vrcp.f32 %v928_v59 }
 0x63b   : > { %1703 = vrcp.f32 %v1101_v62 }
 0x63c   : > { %v1105_v7 = vpop.permute.xlu1 %1104 }
 0x643   : > { %v1700_v63 = vpop.eup %1699 }
 0x644   : > { %v757_v2 = vmul.f32 %v1700_v63, %v1698_v57  ;;  %v1702_v3 = vpop.eup %1701 }
 0x645   : > { %v930_v5 = vmul.f32 %v1702_v3, %v1694_v48  ;;  %v1704_v6 = vpop.eup %1703 }
 0x646   : > { %1537 = vmatmul.mubr.msk.f32.vlgmr.msra.gmra.mrb[6].mxu1 %vm503_vm3, %v757_v2  ;;  %v1103_v8 = vmul.f32 %v1704_v6, %v1696_v53 }
 0x647   : > { %1545 = vmatpush3.msra.mxu1 %v932_v4  ;;  %1546 = vmatprep.mubr.msk.f32.mxu1 %vm1926_vm0, %v1927_v1 }
 0x648   : > { %1554 = vmatprep.subr.mxu1 %v1927_v1 }
 0x64a   : > { %1547 = vmatmul.mubr.msk.f32.vlgmr.msra.gmra.mrb[8].mxu1 %vm503_vm3, %v930_v5 }
 0x64b   : > { %1555 = vmatpush3.msra.mxu1 %v1105_v7  ;;  %1556 = vmatprep.mubr.msk.f32.mxu1 %vm1926_vm0, %v1927_v1 }
 0x64e   : > { %1557 = vmatmul.mubr.msk.f32.vlgmr.msra.gmra.mrb[10].mxu1 %vm503_vm3, %v1103_v8 }
 0x719   : > { %v830_v15 = vpop.f32.mrb[6].mxu1 }
 0x71a   : > { %835 = vrot.lane.b32.xlu1 %v830_v15, %s1939_s17  ;;  %v1538_v16 = vpop.f32.mrb[7].mxu1  ;;  %s1829_s17 = scalar_lea.vmem %s1828_s22, 256 }
 0x71b   : > { %p1831_p9 = scmp.lt.s32.totalorder %s1829_s17, %s1823_s24 }
 0x71d   : > { %v1003_v17 = vpop.f32.mrb[8].mxu1  ;;  %p1832_p5 = por %p1831_p9, %p1830_p4 }
 0x71e   : > { %1008 = vrot.lane.b32.xlu0 %v1003_v17, %s1940_s15  ;;  %v1548_v1 = vpop.f32.mrb[9].mxu1 }
 0x71f   : > { %p1833_p7 = pnand %p1832_p5, %p1826_p3 }
 0x721   : > { %v1176_v18 = vpop.f32.mrb[10].mxu1 }
 0x722   : > { %1181 = vrot.lane.b32.xlu1 %v1176_v18, %s1941_s14  ;;  %v1558_v19 = vpop.f32.mrb[11].mxu1 }
 0x78c   : > { %v836_v20 = vpop.permute.xlu1 %835 }
 0x78d   : > { %839 = vst.msk [vmem:[#allocation3] sm:$0xff] %vm838_vm4, %v836_v20 }
 0x790   : > { %v1009_v21 = vpop.permute.xlu0 %1008 }
 0x791   : > { %1012 = vst.msk [vmem:[#allocation3] sm:$0xff] %vm1011_vm5, %v1009_v21 }
 0x794   : > { %v1182_v0 = vpop.permute.xlu1 %1181 }
 0x795   : > { %1185 = vst.msk [vmem:[#allocation3] sm:$0xff] %vm1184_vm6, %v1182_v0 }
 0x79c   : > { %v1186_v22 = vld [vmem:[#allocation3] sm:$0xff] }
 0x79d   : > { %1568 = vmatmul.mubr.msk.f32.vlgmr.msra.gmra.mrb[6].mxu0 %vm420_vm1, %v1186_v22 }
 0x870   : > { %v1268_v24 = vpop.f32.mrb[6].mxu0 }
 0x871   : > { %v1269_v26 = vadd.f32 %v1474_v23, %v1268_v24  ;;  %v1569_v27 = vpop.f32.mrb[7].mxu0 }
 0x873   : > { %v1273_v28 = vadd.f32 %v1272_v25, %v1269_v26 }
 0x875   : > { %v1274_v29 = vsel %vm420_vm1, %v1273_v28, 0.0 }
 0x876   : > { %1275 = vadd.xlane.f32.xlu0 %v1274_v29 }
 0x903   : > { %v1276_v30 = vpop.xlane.xlu0 %1275 }
 0x904   : > { %v1278_v31 = vmul.f32 0.03125, %v1276_v30 }
 0x906   : > { %v1279_v32 = vsub.f32 %v1273_v28, %v1278_v31 }
 0x908   : > { %v1280_v33 = vmul.f32 %v1279_v32, %v1279_v32 }
 0x90a   : > { %v1281_v34 = vsel %vm420_vm1, %v1280_v33, 0.0 }
 0x90b   : > { %1282 = vadd.xlane.f32.xlu1 %v1281_v34 }
 0x998   : > { %v1283_v35 = vpop.xlane.xlu1 %1282 }
 0x999   : > { %v1284_v36 = vmul.f32 0.03125, %v1283_v35 }
 0x99b   : > { %v1285_v37 = vadd.f32 1e-12, %v1284_v36 }
 0x99d   : > { %1705 = vrsqrt.f32 %v1285_v37 }
 0x9a7   : > { %v1706_v38 = vpop.eup %1705 }
 0x9a8   : > { %v1287_v40 = vmul.f32 %v1706_v38, %v1279_v32 }
 0x9aa   : > { %v1295_v42 = vmul.f32 %v1476_v39, %v1287_v40 }
 0x9ac   : > { %v1303_v43 = vadd.f32 %v1477_v41, %v1295_v42 }
 0x9ae   : > { %1304 = vst.msk [vmem:[%s403_s19] sm:$0xff] %vm420_vm1, %v1303_v43 }
 0x9af   : > { %1836 = shalt.err (!%p1833_p7)
}
 0x9b0   : > { %s1837_s2 = scalar_lea.hbm %s2313_s27, 128  ;;  %s1841_s11 = scalar_lea.hbm %s2371_s8, 256 }
 0x9b1   : > { %p1838_p13 = scmp.ne.s32.totalorder %s2313_s27, %s1837_s2  ;;  %p1842_p2 = scmp.lt.u32.totalorder %s2313_s27, %s2371_s8 }
 0x9b2   : > { %p1843_p12 = scmp.lt.u32.totalorder %s1841_s11, %s1837_s2  ;;  %p1845_p1 = scmp.lt.u32.totalorder %s1837_s2, %s2313_s27 }
 0x9b3   : > { %p1839_p8 = pnand %p1838_p13, %p2402_p6 }
 0x9b4   : > { %p1844_p0 = por %p1843_p12, %p1842_p2 }
 0x9b5   : > { %p1840_p11 = pneg %p1839_p8 }
 0x9b6   : > { %p1846_p10 = por %p1845_p1, %p1844_p0 }
 0x9b8   : > { %p1847_p3 = pnand %p1846_p10, %p1840_p11 }
 0x9ba   : > { %1850 = shalt.err (!%p1847_p3)
}
 0x9bb   : > { %1594 = dma.vmem_to_hbm [thread:$0]  (%p2402_p6), %s2315_s9, 128, %s2313_s27, %s1306_s12  }
 0x9bc PF: > { %s2403_s21 = sld [smem:[#allocation18_spill]]  ;;  %s2404_s23 = sld [smem:[#allocation20_spill]] }
 0x9bd   : > { %p2406_p9 = scmp.ge.s32.totalorder %s1917_s10, 2 }
 0x9c2   : > { %s1332_s25 = sand.u32 1, %s2403_s21   ;;  %p2405_p4 = scmp.ne.s32.totalorder %s2404_s23, 0 }
 0x9c3   : > { %s1333_s4 = scalar_lea.sflag [#allocation6], %s1332_s25 }
 0x9c4   : > { %p1611_p5 = pnand %p2406_p9, %p2405_p4 }
 0x9c6   : > { %1892 = dma.done.wait (!%p1611_p5), %s1333_s4, 128  }
 0x9c7   : > { %1894 = vsyncadd (!%p1611_p5), %s1333_s4, 4294967168  ;;  %s28_s10 = sadd.s32 1, %s1917_s10   ;;  %s2407_s18 = sld [smem:[#allocation22_spill]] }
 0x9c8   : > { %p25_p7 = scmp.ge.s32.totalorder %s28_s10, 4   ;;  %s2408_s30 = sld [smem:[#allocation19_spill]] }
 0x9c9   : > { %s2409_s9 = sld [smem:[#allocation21_spill]]  ;;  %s2410_s27 = smov %s1901_s28 }
 0x9ca   : > { %s2411_s28 = smov %s1905_s29  ;;  %27 = sbr.rel (!%p25_p7) target bundleno = 12 (0xc), region = 123 }
 0x9cd   : > { %s2412_s29 = smov %s2407_s18 }
 0x9d1   :  { %1338 = vsyncpa [#allocation5], 1 }
 0x9d2   :  { %1340 = vsyncpa [#allocation5 + $0x1], 1 }
 0x9d3   :  { %1341 = vsyncpa [#allocation8], 1 }
 0x9d4   :  { %1343 = vsyncpa [#allocation8 + $0x1], 1 }
 0x9d5   :  { %1344 = vsyncpa [#allocation11], 1 }
 0x9d6   :  { %1345 = vsyncpa [#allocation6], 1 }
 0x9d7   :  { %1347 = vsyncpa [#allocation6 + $0x1], 1 }

</bundles_post_ra>
